<compile_context>
chip_gen: v7x
topology: tpu7x:2x2x1
jax: 0.10.0
libtpu: 0.0.40
codegen_flags: <defaults>
</compile_context>

<pallas_src>
import jax
import jax.numpy as jnp
import numpy as np
from jax.experimental import pallas as pl
from jax.experimental.pallas import tpu as pltpu

_K = 5   # pooling kernel size
_P = 2   # pooling padding


def _make_kernel(B, C, NC, H, W, Hp, Wp, L, Lh, Lv):
    """Build the fused pool + 1x1-conv kernel for static shapes."""

    def kernel(x_ref, halo_ref, w_ref, b_ref, avg_ref, max_ref, min_ref):
        # x_ref:    (B, C, L)  zero-padded image, flattened row-major (+ tail pad)
        # halo_ref: (1, 1, L)  additive mask: 0 on valid pixels, -inf on padding
        # w_ref:    (3*NC, C)  SMEM; rows [avg/25 ; max ; min]
        # b_ref:    (3*NC,)    SMEM
        # outputs:  (NC, B, Lv) each; columns W..Wp-1 of every row are junk
        #           lanes that the wrapper drops.
        x = x_ref[...]
        halo = halo_ref[...]

        def pool(xb, op):
            # Separable 5x5 stride-1 pooling on the flattened padded image.
            # Horizontal 1x5 pass: 4 lane-shifted reduces; vertical 5x1 pass:
            # 4 reduces shifted by multiples of Wp.  (The shifted slices
            # materialize via the XLU; count already cut from 24 to 8/branch.)
            h = xb[..., 0:Lh]
            for dx in range(1, _K):
                h = op(h, xb[..., dx:dx + Lh])
            v = h[..., 0:Lv]
            for dy in range(1, _K):
                o = dy * Wp
                v = op(v, h[..., o:o + Lv])
            return v                      # (B, C, Lv)

        def conv1x1_store(v, base, out_ref):
            # 1x1 conv (C -> NC): C and NC are tiny, so VPU broadcast MAC with
            # scalar weights from SMEM (an MXU matmul would be ~all padding).
            # All operands are lane-dense (Lv = H*Wp lanes).
            for k in range(NC):
                acc = v[:, 0, :] * w_ref[base + k, 0]
                for c in range(1, C):
                    acc = acc + v[:, c, :] * w_ref[base + k, c]
                out_ref[k] = acc + b_ref[base + k]     # (B, Lv) lane-dense store

        # Branches run sequentially -> one pooled accumulator live at a time.
        conv1x1_store(pool(x, jnp.add), 0, avg_ref)            # 1/25 folded in w
        conv1x1_store(pool(x + halo, jnp.maximum), NC, max_ref)     # -inf halo
        conv1x1_store(pool(x - halo, jnp.minimum), 2 * NC, min_ref)  # +inf halo

    return kernel


def l2g_classifier_2d_forward(x, img_indices, params):
    """x: (B, C, H, W) f32; img_indices: (B, N, 2) int32 (row, col)."""
    B, C, H, W = x.shape
    NC = params["w_avg"].shape[0]
    Hp, Wp = H + 2 * _P, W + 2 * _P
    Lh = Hp * Wp                 # flattened padded image length
    Lv = H * Wp                  # flattened pooled length (junk cols W..Wp-1)
    L = Lh + (_K - 1)            # tail pad so every horizontal slice is in-bounds

    # Single zero-padded copy of the input, flattened row-major.
    x_pad = jnp.pad(x, ((0, 0), (0, 0), (_P, _P), (_P, _P)))
    x_flat = jnp.pad(x_pad.reshape(B, C, Lh), ((0, 0), (0, 0), (0, _K - 1)))

    # Additive halo mask (0 valid / -inf padding), built once in the wrapper so
    # the kernel needs no integer div/mod:  max uses x+halo, min uses x-halo.
    idx = jnp.arange(L)
    r, c = idx // Wp, idx % Wp
    valid = (r >= _P) & (r < _P + H) & (c >= _P) & (c < _P + W)
    halo = jnp.where(valid, 0.0, -jnp.inf).astype(jnp.float32).reshape(1, 1, L)

    # Pack conv weights: rows [avg/25 ; max ; min]; biases are not scaled.
    w_all = jnp.concatenate(
        [params["w_avg"] * (1.0 / (_K * _K)), params["w_max"], params["w_min"]],
        axis=0).astype(jnp.float32)
    b_all = jnp.concatenate(
        [params["b_avg"], params["b_max"], params["b_min"]],
        axis=0).astype(jnp.float32)

    kernel = _make_kernel(B, C, NC, H, W, Hp, Wp, L, Lh, Lv)
    vmem = pl.BlockSpec(memory_space=pltpu.MemorySpace.VMEM)
    smem = pl.BlockSpec(memory_space=pltpu.MemorySpace.SMEM)
    out_sds = jax.ShapeDtypeStruct((NC, B, Lv), jnp.float32)

    # Single invocation (no grid): the whole problem fits comfortably in VMEM.
    avg_f, max_f, min_f = pl.pallas_call(
        kernel,
        in_specs=[vmem, vmem, smem, smem],
        out_specs=[vmem, vmem, vmem],
        out_shape=[out_sds, out_sds, out_sds],
    )(x_flat, halo, w_all, b_all)

    def unflatten(o):                                # (NC,B,Lv) -> (B,NC,H,W)
        return jnp.transpose(o, (1, 0, 2)).reshape(B, NC, H, Wp)[..., :W]

    avg2d = unflatten(avg_f)
    max2d = unflatten(max_f)
    min2d = unflatten(min_f)

    # Glue: per-batch gather at img_indices (data-dependent), matching
    # permute(0,2,3,1)[i][idx[:,0], idx[:,1]] followed by torch.cat(dim=0).
    def gather_one(feat_k_hw, idxs):
        feat_hwk = jnp.transpose(feat_k_hw, (1, 2, 0))        # (H, W, NC)
        return feat_hwk[idxs[:, 0], idxs[:, 1]]               # (N, NC)

    avg_line = jax.vmap(gather_one)(avg2d, img_indices).reshape(-1, NC)
    max_line = jax.vmap(gather_one)(max2d, img_indices).reshape(-1, NC)
    min_line = jax.vmap(gather_one)(min2d, img_indices).reshape(-1, NC)

    return {
        "feats": (avg_line + max_line + min_line) / 3.0,
        "seg_logit_avg": avg_line,
        "seg_logit_max": max_line,
        "seg_logit_min": min_line,
        "seg_logit_avg_2d": avg2d,
        "seg_logit_max_2d": max2d,
        "seg_logit_min_2d": min2d,
    }


def _reference_forward(x, img_indices, params):
    """Pure-JAX reference for validation."""
    NC = params["w_avg"].shape[0]

    def pool(v, init, op):
        return jax.lax.reduce_window(
            v, init, op, (1, 1, _K, _K), (1, 1, 1, 1),
            [(0, 0), (0, 0), (_P, _P), (_P, _P)])

    avg = pool(x, 0.0, jax.lax.add) / (_K * _K)
    mx = pool(x, -jnp.inf, jax.lax.max)
    mn = -pool(-x, -jnp.inf, jax.lax.max)

    def conv(f, w, b):
        return jnp.einsum("bchw,kc->bkhw", f, w) + b[None, :, None, None]

    avg2d = conv(avg, params["w_avg"], params["b_avg"])
    max2d = conv(mx, params["w_max"], params["b_max"])
    min2d = conv(mn, params["w_min"], params["b_min"])

    def gather_one(feat_k_hw, idx):
        return jnp.transpose(feat_k_hw, (1, 2, 0))[idx[:, 0], idx[:, 1]]

    avg_line = jax.vmap(gather_one)(avg2d, img_indices).reshape(-1, NC)
    max_line = jax.vmap(gather_one)(max2d, img_indices).reshape(-1, NC)
    min_line = jax.vmap(gather_one)(min2d, img_indices).reshape(-1, NC)
    return {
        "feats": (avg_line + max_line + min_line) / 3.0,
        "seg_logit_avg": avg_line,
        "seg_logit_max": max_line,
        "seg_logit_min": min_line,
        "seg_logit_avg_2d": avg2d,
        "seg_logit_max_2d": max2d,
        "seg_logit_min_2d": min2d,
    }


if __name__ == "__main__":
    B, C, H, W = 2, 4, 16, 16      # batch, input_channels, spatial
    NC = 3                         # num_classes
    N = 8                          # sampled pixels per image

    key = jax.random.PRNGKey(0)
    ks = jax.random.split(key, 9)

    x = jax.random.normal(ks[0], (B, C, H, W), jnp.float32)

    # Deterministic synthetic parameters (conv weights (NC, C, 1, 1) -> (NC, C)).
    # The module's nn.Linear(input_channels, num_classes) is unused in
    # forward(), so it is not materialized here.
    params = {
        "w_avg": 0.1 * jax.random.normal(ks[1], (NC, C), jnp.float32),
        "b_avg": 0.1 * jax.random.normal(ks[2], (NC,), jnp.float32),
        "w_max": 0.1 * jax.random.normal(ks[3], (NC, C), jnp.float32),
        "b_max": 0.1 * jax.random.normal(ks[4], (NC,), jnp.float32),
        "w_min": 0.1 * jax.random.normal(ks[5], (NC, C), jnp.float32),
        "b_min": 0.1 * jax.random.normal(ks[6], (NC,), jnp.float32),
    }

    rows = jax.random.randint(ks[7], (B, N, 1), 0, H)
    cols = jax.random.randint(ks[8], (B, N, 1), 0, W)
    img_indices = jnp.concatenate([rows, cols], axis=-1).astype(jnp.int32)

    fwd = jax.jit(l2g_classifier_2d_forward)
    preds = fwd(x, img_indices, params)
    jax.block_until_ready(preds)

    ref = _reference_forward(x, img_indices, params)
    for name in preds:
        np.testing.assert_allclose(np.asarray(preds[name]),
                                   np.asarray(ref[name]),
                                   rtol=1e-5, atol=1e-5)

    print("KERNEL_OK")
</pallas_src>

<mosaic_0001>
module attributes {stable_mosaic.version = 11 : i64} {
  func.func @kernel(%arg0: memref<2x4x404xf32, #tpu.memory_space<vmem>>, %arg1: memref<1x1x404xf32, #tpu.memory_space<vmem>>, %arg2: memref<9x4xf32, #tpu.memory_space<smem>>, %arg3: memref<9xf32, #tpu.memory_space<smem>>, %arg4: memref<3x2x320xf32, #tpu.memory_space<vmem>>, %arg5: memref<3x2x320xf32, #tpu.memory_space<vmem>>, %arg6: memref<3x2x320xf32, #tpu.memory_space<vmem>>) attributes {dimension_semantics = [], scalar_prefetch = 0 : i64, scratch_operands = 0 : i64, tpu.core_type = #tpu.core_type<tc>} {
    %c0 = arith.constant 0 : index
    %c0_0 = arith.constant 0 : index
    %c0_1 = arith.constant 0 : index
    %0 = vector.load %arg0[%c0, %c0_0, %c0_1] : memref<2x4x404xf32, #tpu.memory_space<vmem>>, vector<2x4x404xf32>
    %c0_2 = arith.constant 0 : index
    %c0_3 = arith.constant 0 : index
    %c0_4 = arith.constant 0 : index
    %1 = vector.load %arg1[%c0_2, %c0_3, %c0_4] : memref<1x1x404xf32, #tpu.memory_space<vmem>>, vector<1x1x404xf32>
    %2 = vector.extract_strided_slice %0 {offsets = [0, 0, 0], sizes = [2, 4, 400], strides = [1, 1, 1]} : vector<2x4x404xf32> to vector<2x4x400xf32>
    %3 = vector.extract_strided_slice %0 {offsets = [0, 0, 1], sizes = [2, 4, 400], strides = [1, 1, 1]} : vector<2x4x404xf32> to vector<2x4x400xf32>
    %4 = arith.addf %2, %3 : vector<2x4x400xf32>
    %5 = vector.extract_strided_slice %0 {offsets = [0, 0, 2], sizes = [2, 4, 400], strides = [1, 1, 1]} : vector<2x4x404xf32> to vector<2x4x400xf32>
    %6 = arith.addf %4, %5 : vector<2x4x400xf32>
    %7 = vector.extract_strided_slice %0 {offsets = [0, 0, 3], sizes = [2, 4, 400], strides = [1, 1, 1]} : vector<2x4x404xf32> to vector<2x4x400xf32>
    %8 = arith.addf %6, %7 : vector<2x4x400xf32>
    %9 = vector.extract_strided_slice %0 {offsets = [0, 0, 4], sizes = [2, 4, 400], strides = [1, 1, 1]} : vector<2x4x404xf32> to vector<2x4x400xf32>
    %10 = arith.addf %8, %9 : vector<2x4x400xf32>
    %11 = vector.extract_strided_slice %10 {offsets = [0, 0, 0], sizes = [2, 4, 320], strides = [1, 1, 1]} : vector<2x4x400xf32> to vector<2x4x320xf32>
    %12 = vector.extract_strided_slice %10 {offsets = [0, 0, 20], sizes = [2, 4, 320], strides = [1, 1, 1]} : vector<2x4x400xf32> to vector<2x4x320xf32>
    %13 = arith.addf %11, %12 : vector<2x4x320xf32>
    %14 = vector.extract_strided_slice %10 {offsets = [0, 0, 40], sizes = [2, 4, 320], strides = [1, 1, 1]} : vector<2x4x400xf32> to vector<2x4x320xf32>
    %15 = arith.addf %13, %14 : vector<2x4x320xf32>
    %16 = vector.extract_strided_slice %10 {offsets = [0, 0, 60], sizes = [2, 4, 320], strides = [1, 1, 1]} : vector<2x4x400xf32> to vector<2x4x320xf32>
    %17 = arith.addf %15, %16 : vector<2x4x320xf32>
    %18 = vector.extract_strided_slice %10 {offsets = [0, 0, 80], sizes = [2, 4, 320], strides = [1, 1, 1]} : vector<2x4x400xf32> to vector<2x4x320xf32>
    %19 = arith.addf %17, %18 : vector<2x4x320xf32>
    %20 = vector.extract_strided_slice %19 {offsets = [0, 0, 0], sizes = [2, 1, 320], strides = [1, 1, 1]} : vector<2x4x320xf32> to vector<2x1x320xf32>
    %21 = vector.shape_cast %20 : vector<2x1x320xf32> to vector<2x320xf32>
    %c0_5 = arith.constant 0 : index
    %c0_6 = arith.constant 0 : index
    %22 = memref.load %arg2[%c0_5, %c0_6] : memref<9x4xf32, #tpu.memory_space<smem>>
    %23 = vector.broadcast %22 : f32 to vector<2x320xf32>
    %24 = arith.mulf %21, %23 : vector<2x320xf32>
    %25 = vector.extract_strided_slice %19 {offsets = [0, 1, 0], sizes = [2, 1, 320], strides = [1, 1, 1]} : vector<2x4x320xf32> to vector<2x1x320xf32>
    %26 = vector.shape_cast %25 : vector<2x1x320xf32> to vector<2x320xf32>
    %c0_7 = arith.constant 0 : index
    %c1 = arith.constant 1 : index
    %27 = memref.load %arg2[%c0_7, %c1] : memref<9x4xf32, #tpu.memory_space<smem>>
    %28 = vector.broadcast %27 : f32 to vector<2x320xf32>
    %29 = arith.mulf %26, %28 : vector<2x320xf32>
    %30 = arith.addf %24, %29 : vector<2x320xf32>
    %31 = vector.extract_strided_slice %19 {offsets = [0, 2, 0], sizes = [2, 1, 320], strides = [1, 1, 1]} : vector<2x4x320xf32> to vector<2x1x320xf32>
    %32 = vector.shape_cast %31 : vector<2x1x320xf32> to vector<2x320xf32>
    %c0_8 = arith.constant 0 : index
    %c2 = arith.constant 2 : index
    %33 = memref.load %arg2[%c0_8, %c2] : memref<9x4xf32, #tpu.memory_space<smem>>
    %34 = vector.broadcast %33 : f32 to vector<2x320xf32>
    %35 = arith.mulf %32, %34 : vector<2x320xf32>
    %36 = arith.addf %30, %35 : vector<2x320xf32>
    %37 = vector.extract_strided_slice %19 {offsets = [0, 3, 0], sizes = [2, 1, 320], strides = [1, 1, 1]} : vector<2x4x320xf32> to vector<2x1x320xf32>
    %38 = vector.shape_cast %37 : vector<2x1x320xf32> to vector<2x320xf32>
    %c0_9 = arith.constant 0 : index
    %c3 = arith.constant 3 : index
    %39 = memref.load %arg2[%c0_9, %c3] : memref<9x4xf32, #tpu.memory_space<smem>>
    %40 = vector.broadcast %39 : f32 to vector<2x320xf32>
    %41 = arith.mulf %38, %40 : vector<2x320xf32>
    %42 = arith.addf %36, %41 : vector<2x320xf32>
    %c0_10 = arith.constant 0 : index
    %43 = memref.load %arg3[%c0_10] : memref<9xf32, #tpu.memory_space<smem>>
    %44 = vector.broadcast %43 : f32 to vector<2x320xf32>
    %45 = arith.addf %42, %44 : vector<2x320xf32>
    %c0_11 = arith.constant 0 : index
    %c0_12 = arith.constant 0 : index
    %c0_13 = arith.constant 0 : index
    %46 = vector.load %arg4[%c0_11, %c0_12, %c0_13] : memref<3x2x320xf32, #tpu.memory_space<vmem>>, vector<1x2x320xf32>
    %47 = vector.shape_cast %46 : vector<1x2x320xf32> to vector<2x320xf32>
    %48 = vector.shape_cast %45 : vector<2x320xf32> to vector<1x2x320xf32>
    tpu.vector_store %arg4[%c0_11, %c0_12, %c0_13], %48 {strides = array<i32>} : memref<3x2x320xf32, #tpu.memory_space<vmem>>, vector<1x2x320xf32>,
    %49 = vector.extract_strided_slice %19 {offsets = [0, 0, 0], sizes = [2, 1, 320], strides = [1, 1, 1]} : vector<2x4x320xf32> to vector<2x1x320xf32>
    %50 = vector.shape_cast %49 : vector<2x1x320xf32> to vector<2x320xf32>
    %c1_14 = arith.constant 1 : index
    %c0_15 = arith.constant 0 : index
    %51 = memref.load %arg2[%c1_14, %c0_15] : memref<9x4xf32, #tpu.memory_space<smem>>
    %52 = vector.broadcast %51 : f32 to vector<2x320xf32>
    %53 = arith.mulf %50, %52 : vector<2x320xf32>
    %54 = vector.extract_strided_slice %19 {offsets = [0, 1, 0], sizes = [2, 1, 320], strides = [1, 1, 1]} : vector<2x4x320xf32> to vector<2x1x320xf32>
    %55 = vector.shape_cast %54 : vector<2x1x320xf32> to vector<2x320xf32>
    %c1_16 = arith.constant 1 : index
    %c1_17 = arith.constant 1 : index
    %56 = memref.load %arg2[%c1_16, %c1_17] : memref<9x4xf32, #tpu.memory_space<smem>>
    %57 = vector.broadcast %56 : f32 to vector<2x320xf32>
    %58 = arith.mulf %55, %57 : vector<2x320xf32>
    %59 = arith.addf %53, %58 : vector<2x320xf32>
    %60 = vector.extract_strided_slice %19 {offsets = [0, 2, 0], sizes = [2, 1, 320], strides = [1, 1, 1]} : vector<2x4x320xf32> to vector<2x1x320xf32>
    %61 = vector.shape_cast %60 : vector<2x1x320xf32> to vector<2x320xf32>
    %c1_18 = arith.constant 1 : index
    %c2_19 = arith.constant 2 : index
    %62 = memref.load %arg2[%c1_18, %c2_19] : memref<9x4xf32, #tpu.memory_space<smem>>
    %63 = vector.broadcast %62 : f32 to vector<2x320xf32>
    %64 = arith.mulf %61, %63 : vector<2x320xf32>
    %65 = arith.addf %59, %64 : vector<2x320xf32>
    %66 = vector.extract_strided_slice %19 {offsets = [0, 3, 0], sizes = [2, 1, 320], strides = [1, 1, 1]} : vector<2x4x320xf32> to vector<2x1x320xf32>
    %67 = vector.shape_cast %66 : vector<2x1x320xf32> to vector<2x320xf32>
    %c1_20 = arith.constant 1 : index
    %c3_21 = arith.constant 3 : index
    %68 = memref.load %arg2[%c1_20, %c3_21] : memref<9x4xf32, #tpu.memory_space<smem>>
    %69 = vector.broadcast %68 : f32 to vector<2x320xf32>
    %70 = arith.mulf %67, %69 : vector<2x320xf32>
    %71 = arith.addf %65, %70 : vector<2x320xf32>
    %c1_22 = arith.constant 1 : index
    %72 = memref.load %arg3[%c1_22] : memref<9xf32, #tpu.memory_space<smem>>
    %73 = vector.broadcast %72 : f32 to vector<2x320xf32>
    %74 = arith.addf %71, %73 : vector<2x320xf32>
    %c1_23 = arith.constant 1 : index
    %c0_24 = arith.constant 0 : index
    %c0_25 = arith.constant 0 : index
    %75 = vector.load %arg4[%c1_23, %c0_24, %c0_25] : memref<3x2x320xf32, #tpu.memory_space<vmem>>, vector<1x2x320xf32>
    %76 = vector.shape_cast %75 : vector<1x2x320xf32> to vector<2x320xf32>
    %77 = vector.shape_cast %74 : vector<2x320xf32> to vector<1x2x320xf32>
    tpu.vector_store %arg4[%c1_23, %c0_24, %c0_25], %77 {strides = array<i32>} : memref<3x2x320xf32, #tpu.memory_space<vmem>>, vector<1x2x320xf32>,
    %78 = vector.extract_strided_slice %19 {offsets = [0, 0, 0], sizes = [2, 1, 320], strides = [1, 1, 1]} : vector<2x4x320xf32> to vector<2x1x320xf32>
    %79 = vector.shape_cast %78 : vector<2x1x320xf32> to vector<2x320xf32>
    %c2_26 = arith.constant 2 : index
    %c0_27 = arith.constant 0 : index
    %80 = memref.load %arg2[%c2_26, %c0_27] : memref<9x4xf32, #tpu.memory_space<smem>>
    %81 = vector.broadcast %80 : f32 to vector<2x320xf32>
    %82 = arith.mulf %79, %81 : vector<2x320xf32>
    %83 = vector.extract_strided_slice %19 {offsets = [0, 1, 0], sizes = [2, 1, 320], strides = [1, 1, 1]} : vector<2x4x320xf32> to vector<2x1x320xf32>
    %84 = vector.shape_cast %83 : vector<2x1x320xf32> to vector<2x320xf32>
    %c2_28 = arith.constant 2 : index
    %c1_29 = arith.constant 1 : index
    %85 = memref.load %arg2[%c2_28, %c1_29] : memref<9x4xf32, #tpu.memory_space<smem>>
    %86 = vector.broadcast %85 : f32 to vector<2x320xf32>
    %87 = arith.mulf %84, %86 : vector<2x320xf32>
    %88 = arith.addf %82, %87 : vector<2x320xf32>
    %89 = vector.extract_strided_slice %19 {offsets = [0, 2, 0], sizes = [2, 1, 320], strides = [1, 1, 1]} : vector<2x4x320xf32> to vector<2x1x320xf32>
    %90 = vector.shape_cast %89 : vector<2x1x320xf32> to vector<2x320xf32>
    %c2_30 = arith.constant 2 : index
    %c2_31 = arith.constant 2 : index
    %91 = memref.load %arg2[%c2_30, %c2_31] : memref<9x4xf32, #tpu.memory_space<smem>>
    %92 = vector.broadcast %91 : f32 to vector<2x320xf32>
    %93 = arith.mulf %90, %92 : vector<2x320xf32>
    %94 = arith.addf %88, %93 : vector<2x320xf32>
    %95 = vector.extract_strided_slice %19 {offsets = [0, 3, 0], sizes = [2, 1, 320], strides = [1, 1, 1]} : vector<2x4x320xf32> to vector<2x1x320xf32>
    %96 = vector.shape_cast %95 : vector<2x1x320xf32> to vector<2x320xf32>
    %c2_32 = arith.constant 2 : index
    %c3_33 = arith.constant 3 : index
    %97 = memref.load %arg2[%c2_32, %c3_33] : memref<9x4xf32, #tpu.memory_space<smem>>
    %98 = vector.broadcast %97 : f32 to vector<2x320xf32>
    %99 = arith.mulf %96, %98 : vector<2x320xf32>
    %100 = arith.addf %94, %99 : vector<2x320xf32>
    %c2_34 = arith.constant 2 : index
    %101 = memref.load %arg3[%c2_34] : memref<9xf32, #tpu.memory_space<smem>>
    %102 = vector.broadcast %101 : f32 to vector<2x320xf32>
    %103 = arith.addf %100, %102 : vector<2x320xf32>
    %c2_35 = arith.constant 2 : index
    %c0_36 = arith.constant 0 : index
    %c0_37 = arith.constant 0 : index
    %104 = vector.load %arg4[%c2_35, %c0_36, %c0_37] : memref<3x2x320xf32, #tpu.memory_space<vmem>>, vector<1x2x320xf32>
    %105 = vector.shape_cast %104 : vector<1x2x320xf32> to vector<2x320xf32>
    %106 = vector.shape_cast %103 : vector<2x320xf32> to vector<1x2x320xf32>
    tpu.vector_store %arg4[%c2_35, %c0_36, %c0_37], %106 {strides = array<i32>} : memref<3x2x320xf32, #tpu.memory_space<vmem>>, vector<1x2x320xf32>,
    %107 = vector.broadcast %1 : vector<1x1x404xf32> to vector<2x4x404xf32>
    %108 = arith.addf %0, %107 : vector<2x4x404xf32>
    %109 = vector.extract_strided_slice %108 {offsets = [0, 0, 0], sizes = [2, 4, 400], strides = [1, 1, 1]} : vector<2x4x404xf32> to vector<2x4x400xf32>
    %110 = vector.extract_strided_slice %108 {offsets = [0, 0, 1], sizes = [2, 4, 400], strides = [1, 1, 1]} : vector<2x4x404xf32> to vector<2x4x400xf32>
    %111 = arith.maximumf %109, %110 : vector<2x4x400xf32>
    %112 = vector.extract_strided_slice %108 {offsets = [0, 0, 2], sizes = [2, 4, 400], strides = [1, 1, 1]} : vector<2x4x404xf32> to vector<2x4x400xf32>
    %113 = arith.maximumf %111, %112 : vector<2x4x400xf32>
    %114 = vector.extract_strided_slice %108 {offsets = [0, 0, 3], sizes = [2, 4, 400], strides = [1, 1, 1]} : vector<2x4x404xf32> to vector<2x4x400xf32>
    %115 = arith.maximumf %113, %114 : vector<2x4x400xf32>
    %116 = vector.extract_strided_slice %108 {offsets = [0, 0, 4], sizes = [2, 4, 400], strides = [1, 1, 1]} : vector<2x4x404xf32> to vector<2x4x400xf32>
    %117 = arith.maximumf %115, %116 : vector<2x4x400xf32>
    %118 = vector.extract_strided_slice %117 {offsets = [0, 0, 0], sizes = [2, 4, 320], strides = [1, 1, 1]} : vector<2x4x400xf32> to vector<2x4x320xf32>
    %119 = vector.extract_strided_slice %117 {offsets = [0, 0, 20], sizes = [2, 4, 320], strides = [1, 1, 1]} : vector<2x4x400xf32> to vector<2x4x320xf32>
    %120 = arith.maximumf %118, %119 : vector<2x4x320xf32>
    %121 = vector.extract_strided_slice %117 {offsets = [0, 0, 40], sizes = [2, 4, 320], strides = [1, 1, 1]} : vector<2x4x400xf32> to vector<2x4x320xf32>
    %122 = arith.maximumf %120, %121 : vector<2x4x320xf32>
    %123 = vector.extract_strided_slice %117 {offsets = [0, 0, 60], sizes = [2, 4, 320], strides = [1, 1, 1]} : vector<2x4x400xf32> to vector<2x4x320xf32>
    %124 = arith.maximumf %122, %123 : vector<2x4x320xf32>
    %125 = vector.extract_strided_slice %117 {offsets = [0, 0, 80], sizes = [2, 4, 320], strides = [1, 1, 1]} : vector<2x4x400xf32> to vector<2x4x320xf32>
    %126 = arith.maximumf %124, %125 : vector<2x4x320xf32>
    %127 = vector.extract_strided_slice %126 {offsets = [0, 0, 0], sizes = [2, 1, 320], strides = [1, 1, 1]} : vector<2x4x320xf32> to vector<2x1x320xf32>
    %128 = vector.shape_cast %127 : vector<2x1x320xf32> to vector<2x320xf32>
    %c3_38 = arith.constant 3 : index
    %c0_39 = arith.constant 0 : index
    %129 = memref.load %arg2[%c3_38, %c0_39] : memref<9x4xf32, #tpu.memory_space<smem>>
    %130 = vector.broadcast %129 : f32 to vector<2x320xf32>
    %131 = arith.mulf %128, %130 : vector<2x320xf32>
    %132 = vector.extract_strided_slice %126 {offsets = [0, 1, 0], sizes = [2, 1, 320], strides = [1, 1, 1]} : vector<2x4x320xf32> to vector<2x1x320xf32>
    %133 = vector.shape_cast %132 : vector<2x1x320xf32> to vector<2x320xf32>
    %c3_40 = arith.constant 3 : index
    %c1_41 = arith.constant 1 : index
    %134 = memref.load %arg2[%c3_40, %c1_41] : memref<9x4xf32, #tpu.memory_space<smem>>
    %135 = vector.broadcast %134 : f32 to vector<2x320xf32>
    %136 = arith.mulf %133, %135 : vector<2x320xf32>
    %137 = arith.addf %131, %136 : vector<2x320xf32>
    %138 = vector.extract_strided_slice %126 {offsets = [0, 2, 0], sizes = [2, 1, 320], strides = [1, 1, 1]} : vector<2x4x320xf32> to vector<2x1x320xf32>
    %139 = vector.shape_cast %138 : vector<2x1x320xf32> to vector<2x320xf32>
    %c3_42 = arith.constant 3 : index
    %c2_43 = arith.constant 2 : index
    %140 = memref.load %arg2[%c3_42, %c2_43] : memref<9x4xf32, #tpu.memory_space<smem>>
    %141 = vector.broadcast %140 : f32 to vector<2x320xf32>
    %142 = arith.mulf %139, %141 : vector<2x320xf32>
    %143 = arith.addf %137, %142 : vector<2x320xf32>
    %144 = vector.extract_strided_slice %126 {offsets = [0, 3, 0], sizes = [2, 1, 320], strides = [1, 1, 1]} : vector<2x4x320xf32> to vector<2x1x320xf32>
    %145 = vector.shape_cast %144 : vector<2x1x320xf32> to vector<2x320xf32>
    %c3_44 = arith.constant 3 : index
    %c3_45 = arith.constant 3 : index
    %146 = memref.load %arg2[%c3_44, %c3_45] : memref<9x4xf32, #tpu.memory_space<smem>>
    %147 = vector.broadcast %146 : f32 to vector<2x320xf32>
    %148 = arith.mulf %145, %147 : vector<2x320xf32>
    %149 = arith.addf %143, %148 : vector<2x320xf32>
    %c3_46 = arith.constant 3 : index
    %150 = memref.load %arg3[%c3_46] : memref<9xf32, #tpu.memory_space<smem>>
    %151 = vector.broadcast %150 : f32 to vector<2x320xf32>
    %152 = arith.addf %149, %151 : vector<2x320xf32>
    %c0_47 = arith.constant 0 : index
    %c0_48 = arith.constant 0 : index
    %c0_49 = arith.constant 0 : index
    %153 = vector.load %arg5[%c0_47, %c0_48, %c0_49] : memref<3x2x320xf32, #tpu.memory_space<vmem>>, vector<1x2x320xf32>
    %154 = vector.shape_cast %153 : vector<1x2x320xf32> to vector<2x320xf32>
    %155 = vector.shape_cast %152 : vector<2x320xf32> to vector<1x2x320xf32>
    tpu.vector_store %arg5[%c0_47, %c0_48, %c0_49], %155 {strides = array<i32>} : memref<3x2x320xf32, #tpu.memory_space<vmem>>, vector<1x2x320xf32>,
    %156 = vector.extract_strided_slice %126 {offsets = [0, 0, 0], sizes = [2, 1, 320], strides = [1, 1, 1]} : vector<2x4x320xf32> to vector<2x1x320xf32>
    %157 = vector.shape_cast %156 : vector<2x1x320xf32> to vector<2x320xf32>
    %c4 = arith.constant 4 : index
    %c0_50 = arith.constant 0 : index
    %158 = memref.load %arg2[%c4, %c0_50] : memref<9x4xf32, #tpu.memory_space<smem>>
    %159 = vector.broadcast %158 : f32 to vector<2x320xf32>
    %160 = arith.mulf %157, %159 : vector<2x320xf32>
    %161 = vector.extract_strided_slice %126 {offsets = [0, 1, 0], sizes = [2, 1, 320], strides = [1, 1, 1]} : vector<2x4x320xf32> to vector<2x1x320xf32>
    %162 = vector.shape_cast %161 : vector<2x1x320xf32> to vector<2x320xf32>
    %c4_51 = arith.constant 4 : index
    %c1_52 = arith.constant 1 : index
    %163 = memref.load %arg2[%c4_51, %c1_52] : memref<9x4xf32, #tpu.memory_space<smem>>
    %164 = vector.broadcast %163 : f32 to vector<2x320xf32>
    %165 = arith.mulf %162, %164 : vector<2x320xf32>
    %166 = arith.addf %160, %165 : vector<2x320xf32>
    %167 = vector.extract_strided_slice %126 {offsets = [0, 2, 0], sizes = [2, 1, 320], strides = [1, 1, 1]} : vector<2x4x320xf32> to vector<2x1x320xf32>
    %168 = vector.shape_cast %167 : vector<2x1x320xf32> to vector<2x320xf32>
    %c4_53 = arith.constant 4 : index
    %c2_54 = arith.constant 2 : index
    %169 = memref.load %arg2[%c4_53, %c2_54] : memref<9x4xf32, #tpu.memory_space<smem>>
    %170 = vector.broadcast %169 : f32 to vector<2x320xf32>
    %171 = arith.mulf %168, %170 : vector<2x320xf32>
    %172 = arith.addf %166, %171 : vector<2x320xf32>
    %173 = vector.extract_strided_slice %126 {offsets = [0, 3, 0], sizes = [2, 1, 320], strides = [1, 1, 1]} : vector<2x4x320xf32> to vector<2x1x320xf32>
    %174 = vector.shape_cast %173 : vector<2x1x320xf32> to vector<2x320xf32>
    %c4_55 = arith.constant 4 : index
    %c3_56 = arith.constant 3 : index
    %175 = memref.load %arg2[%c4_55, %c3_56] : memref<9x4xf32, #tpu.memory_space<smem>>
    %176 = vector.broadcast %175 : f32 to vector<2x320xf32>
    %177 = arith.mulf %174, %176 : vector<2x320xf32>
    %178 = arith.addf %172, %177 : vector<2x320xf32>
    %c4_57 = arith.constant 4 : index
    %179 = memref.load %arg3[%c4_57] : memref<9xf32, #tpu.memory_space<smem>>
    %180 = vector.broadcast %179 : f32 to vector<2x320xf32>
    %181 = arith.addf %178, %180 : vector<2x320xf32>
    %c1_58 = arith.constant 1 : index
    %c0_59 = arith.constant 0 : index
    %c0_60 = arith.constant 0 : index
    %182 = vector.load %arg5[%c1_58, %c0_59, %c0_60] : memref<3x2x320xf32, #tpu.memory_space<vmem>>, vector<1x2x320xf32>
    %183 = vector.shape_cast %182 : vector<1x2x320xf32> to vector<2x320xf32>
    %184 = vector.shape_cast %181 : vector<2x320xf32> to vector<1x2x320xf32>
    tpu.vector_store %arg5[%c1_58, %c0_59, %c0_60], %184 {strides = array<i32>} : memref<3x2x320xf32, #tpu.memory_space<vmem>>, vector<1x2x320xf32>,
    %185 = vector.extract_strided_slice %126 {offsets = [0, 0, 0], sizes = [2, 1, 320], strides = [1, 1, 1]} : vector<2x4x320xf32> to vector<2x1x320xf32>
    %186 = vector.shape_cast %185 : vector<2x1x320xf32> to vector<2x320xf32>
    %c5 = arith.constant 5 : index
    %c0_61 = arith.constant 0 : index
    %187 = memref.load %arg2[%c5, %c0_61] : memref<9x4xf32, #tpu.memory_space<smem>>
    %188 = vector.broadcast %187 : f32 to vector<2x320xf32>
    %189 = arith.mulf %186, %188 : vector<2x320xf32>
    %190 = vector.extract_strided_slice %126 {offsets = [0, 1, 0], sizes = [2, 1, 320], strides = [1, 1, 1]} : vector<2x4x320xf32> to vector<2x1x320xf32>
    %191 = vector.shape_cast %190 : vector<2x1x320xf32> to vector<2x320xf32>
    %c5_62 = arith.constant 5 : index
    %c1_63 = arith.constant 1 : index
    %192 = memref.load %arg2[%c5_62, %c1_63] : memref<9x4xf32, #tpu.memory_space<smem>>
    %193 = vector.broadcast %192 : f32 to vector<2x320xf32>
    %194 = arith.mulf %191, %193 : vector<2x320xf32>
    %195 = arith.addf %189, %194 : vector<2x320xf32>
    %196 = vector.extract_strided_slice %126 {offsets = [0, 2, 0], sizes = [2, 1, 320], strides = [1, 1, 1]} : vector<2x4x320xf32> to vector<2x1x320xf32>
    %197 = vector.shape_cast %196 : vector<2x1x320xf32> to vector<2x320xf32>
    %c5_64 = arith.constant 5 : index
    %c2_65 = arith.constant 2 : index
    %198 = memref.load %arg2[%c5_64, %c2_65] : memref<9x4xf32, #tpu.memory_space<smem>>
    %199 = vector.broadcast %198 : f32 to vector<2x320xf32>
    %200 = arith.mulf %197, %199 : vector<2x320xf32>
    %201 = arith.addf %195, %200 : vector<2x320xf32>
    %202 = vector.extract_strided_slice %126 {offsets = [0, 3, 0], sizes = [2, 1, 320], strides = [1, 1, 1]} : vector<2x4x320xf32> to vector<2x1x320xf32>
    %203 = vector.shape_cast %202 : vector<2x1x320xf32> to vector<2x320xf32>
    %c5_66 = arith.constant 5 : index
    %c3_67 = arith.constant 3 : index
    %204 = memref.load %arg2[%c5_66, %c3_67] : memref<9x4xf32, #tpu.memory_space<smem>>
    %205 = vector.broadcast %204 : f32 to vector<2x320xf32>
    %206 = arith.mulf %203, %205 : vector<2x320xf32>
    %207 = arith.addf %201, %206 : vector<2x320xf32>
    %c5_68 = arith.constant 5 : index
    %208 = memref.load %arg3[%c5_68] : memref<9xf32, #tpu.memory_space<smem>>
    %209 = vector.broadcast %208 : f32 to vector<2x320xf32>
    %210 = arith.addf %207, %209 : vector<2x320xf32>
    %c2_69 = arith.constant 2 : index
    %c0_70 = arith.constant 0 : index
    %c0_71 = arith.constant 0 : index
    %211 = vector.load %arg5[%c2_69, %c0_70, %c0_71] : memref<3x2x320xf32, #tpu.memory_space<vmem>>, vector<1x2x320xf32>
    %212 = vector.shape_cast %211 : vector<1x2x320xf32> to vector<2x320xf32>
    %213 = vector.shape_cast %210 : vector<2x320xf32> to vector<1x2x320xf32>
    tpu.vector_store %arg5[%c2_69, %c0_70, %c0_71], %213 {strides = array<i32>} : memref<3x2x320xf32, #tpu.memory_space<vmem>>, vector<1x2x320xf32>,
    %214 = vector.broadcast %1 : vector<1x1x404xf32> to vector<2x4x404xf32>
    %215 = arith.subf %0, %214 : vector<2x4x404xf32>
    %216 = vector.extract_strided_slice %215 {offsets = [0, 0, 0], sizes = [2, 4, 400], strides = [1, 1, 1]} : vector<2x4x404xf32> to vector<2x4x400xf32>
    %217 = vector.extract_strided_slice %215 {offsets = [0, 0, 1], sizes = [2, 4, 400], strides = [1, 1, 1]} : vector<2x4x404xf32> to vector<2x4x400xf32>
    %218 = arith.minimumf %216, %217 : vector<2x4x400xf32>
    %219 = vector.extract_strided_slice %215 {offsets = [0, 0, 2], sizes = [2, 4, 400], strides = [1, 1, 1]} : vector<2x4x404xf32> to vector<2x4x400xf32>
    %220 = arith.minimumf %218, %219 : vector<2x4x400xf32>
    %221 = vector.extract_strided_slice %215 {offsets = [0, 0, 3], sizes = [2, 4, 400], strides = [1, 1, 1]} : vector<2x4x404xf32> to vector<2x4x400xf32>
    %222 = arith.minimumf %220, %221 : vector<2x4x400xf32>
    %223 = vector.extract_strided_slice %215 {offsets = [0, 0, 4], sizes = [2, 4, 400], strides = [1, 1, 1]} : vector<2x4x404xf32> to vector<2x4x400xf32>
    %224 = arith.minimumf %222, %223 : vector<2x4x400xf32>
    %225 = vector.extract_strided_slice %224 {offsets = [0, 0, 0], sizes = [2, 4, 320], strides = [1, 1, 1]} : vector<2x4x400xf32> to vector<2x4x320xf32>
    %226 = vector.extract_strided_slice %224 {offsets = [0, 0, 20], sizes = [2, 4, 320], strides = [1, 1, 1]} : vector<2x4x400xf32> to vector<2x4x320xf32>
    %227 = arith.minimumf %225, %226 : vector<2x4x320xf32>
    %228 = vector.extract_strided_slice %224 {offsets = [0, 0, 40], sizes = [2, 4, 320], strides = [1, 1, 1]} : vector<2x4x400xf32> to vector<2x4x320xf32>
    %229 = arith.minimumf %227, %228 : vector<2x4x320xf32>
    %230 = vector.extract_strided_slice %224 {offsets = [0, 0, 60], sizes = [2, 4, 320], strides = [1, 1, 1]} : vector<2x4x400xf32> to vector<2x4x320xf32>
    %231 = arith.minimumf %229, %230 : vector<2x4x320xf32>
    %232 = vector.extract_strided_slice %224 {offsets = [0, 0, 80], sizes = [2, 4, 320], strides = [1, 1, 1]} : vector<2x4x400xf32> to vector<2x4x320xf32>
    %233 = arith.minimumf %231, %232 : vector<2x4x320xf32>
    %234 = vector.extract_strided_slice %233 {offsets = [0, 0, 0], sizes = [2, 1, 320], strides = [1, 1, 1]} : vector<2x4x320xf32> to vector<2x1x320xf32>
    %235 = vector.shape_cast %234 : vector<2x1x320xf32> to vector<2x320xf32>
    %c6 = arith.constant 6 : index
    %c0_72 = arith.constant 0 : index
    %236 = memref.load %arg2[%c6, %c0_72] : memref<9x4xf32, #tpu.memory_space<smem>>
    %237 = vector.broadcast %236 : f32 to vector<2x320xf32>
    %238 = arith.mulf %235, %237 : vector<2x320xf32>
    %239 = vector.extract_strided_slice %233 {offsets = [0, 1, 0], sizes = [2, 1, 320], strides = [1, 1, 1]} : vector<2x4x320xf32> to vector<2x1x320xf32>
    %240 = vector.shape_cast %239 : vector<2x1x320xf32> to vector<2x320xf32>
    %c6_73 = arith.constant 6 : index
    %c1_74 = arith.constant 1 : index
    %241 = memref.load %arg2[%c6_73, %c1_74] : memref<9x4xf32, #tpu.memory_space<smem>>
    %242 = vector.broadcast %241 : f32 to vector<2x320xf32>
    %243 = arith.mulf %240, %242 : vector<2x320xf32>
    %244 = arith.addf %238, %243 : vector<2x320xf32>
    %245 = vector.extract_strided_slice %233 {offsets = [0, 2, 0], sizes = [2, 1, 320], strides = [1, 1, 1]} : vector<2x4x320xf32> to vector<2x1x320xf32>
    %246 = vector.shape_cast %245 : vector<2x1x320xf32> to vector<2x320xf32>
    %c6_75 = arith.constant 6 : index
    %c2_76 = arith.constant 2 : index
    %247 = memref.load %arg2[%c6_75, %c2_76] : memref<9x4xf32, #tpu.memory_space<smem>>
    %248 = vector.broadcast %247 : f32 to vector<2x320xf32>
    %249 = arith.mulf %246, %248 : vector<2x320xf32>
    %250 = arith.addf %244, %249 : vector<2x320xf32>
    %251 = vector.extract_strided_slice %233 {offsets = [0, 3, 0], sizes = [2, 1, 320], strides = [1, 1, 1]} : vector<2x4x320xf32> to vector<2x1x320xf32>
    %252 = vector.shape_cast %251 : vector<2x1x320xf32> to vector<2x320xf32>
    %c6_77 = arith.constant 6 : index
    %c3_78 = arith.constant 3 : index
    %253 = memref.load %arg2[%c6_77, %c3_78] : memref<9x4xf32, #tpu.memory_space<smem>>
    %254 = vector.broadcast %253 : f32 to vector<2x320xf32>
    %255 = arith.mulf %252, %254 : vector<2x320xf32>
    %256 = arith.addf %250, %255 : vector<2x320xf32>
    %c6_79 = arith.constant 6 : index
    %257 = memref.load %arg3[%c6_79] : memref<9xf32, #tpu.memory_space<smem>>
    %258 = vector.broadcast %257 : f32 to vector<2x320xf32>
    %259 = arith.addf %256, %258 : vector<2x320xf32>
    %c0_80 = arith.constant 0 : index
    %c0_81 = arith.constant 0 : index
    %c0_82 = arith.constant 0 : index
    %260 = vector.load %arg6[%c0_80, %c0_81, %c0_82] : memref<3x2x320xf32, #tpu.memory_space<vmem>>, vector<1x2x320xf32>
    %261 = vector.shape_cast %260 : vector<1x2x320xf32> to vector<2x320xf32>
    %262 = vector.shape_cast %259 : vector<2x320xf32> to vector<1x2x320xf32>
    tpu.vector_store %arg6[%c0_80, %c0_81, %c0_82], %262 {strides = array<i32>} : memref<3x2x320xf32, #tpu.memory_space<vmem>>, vector<1x2x320xf32>,
    %263 = vector.extract_strided_slice %233 {offsets = [0, 0, 0], sizes = [2, 1, 320], strides = [1, 1, 1]} : vector<2x4x320xf32> to vector<2x1x320xf32>
    %264 = vector.shape_cast %263 : vector<2x1x320xf32> to vector<2x320xf32>
    %c7 = arith.constant 7 : index
    %c0_83 = arith.constant 0 : index
    %265 = memref.load %arg2[%c7, %c0_83] : memref<9x4xf32, #tpu.memory_space<smem>>
    %266 = vector.broadcast %265 : f32 to vector<2x320xf32>
    %267 = arith.mulf %264, %266 : vector<2x320xf32>
    %268 = vector.extract_strided_slice %233 {offsets = [0, 1, 0], sizes = [2, 1, 320], strides = [1, 1, 1]} : vector<2x4x320xf32> to vector<2x1x320xf32>
    %269 = vector.shape_cast %268 : vector<2x1x320xf32> to vector<2x320xf32>
    %c7_84 = arith.constant 7 : index
    %c1_85 = arith.constant 1 : index
    %270 = memref.load %arg2[%c7_84, %c1_85] : memref<9x4xf32, #tpu.memory_space<smem>>
    %271 = vector.broadcast %270 : f32 to vector<2x320xf32>
    %272 = arith.mulf %269, %271 : vector<2x320xf32>
    %273 = arith.addf %267, %272 : vector<2x320xf32>
    %274 = vector.extract_strided_slice %233 {offsets = [0, 2, 0], sizes = [2, 1, 320], strides = [1, 1, 1]} : vector<2x4x320xf32> to vector<2x1x320xf32>
    %275 = vector.shape_cast %274 : vector<2x1x320xf32> to vector<2x320xf32>
    %c7_86 = arith.constant 7 : index
    %c2_87 = arith.constant 2 : index
    %276 = memref.load %arg2[%c7_86, %c2_87] : memref<9x4xf32, #tpu.memory_space<smem>>
    %277 = vector.broadcast %276 : f32 to vector<2x320xf32>
    %278 = arith.mulf %275, %277 : vector<2x320xf32>
    %279 = arith.addf %273, %278 : vector<2x320xf32>
    %280 = vector.extract_strided_slice %233 {offsets = [0, 3, 0], sizes = [2, 1, 320], strides = [1, 1, 1]} : vector<2x4x320xf32> to vector<2x1x320xf32>
    %281 = vector.shape_cast %280 : vector<2x1x320xf32> to vector<2x320xf32>
    %c7_88 = arith.constant 7 : index
    %c3_89 = arith.constant 3 : index
    %282 = memref.load %arg2[%c7_88, %c3_89] : memref<9x4xf32, #tpu.memory_space<smem>>
    %283 = vector.broadcast %282 : f32 to vector<2x320xf32>
    %284 = arith.mulf %281, %283 : vector<2x320xf32>
    %285 = arith.addf %279, %284 : vector<2x320xf32>
    %c7_90 = arith.constant 7 : index
    %286 = memref.load %arg3[%c7_90] : memref<9xf32, #tpu.memory_space<smem>>
    %287 = vector.broadcast %286 : f32 to vector<2x320xf32>
    %288 = arith.addf %285, %287 : vector<2x320xf32>
    %c1_91 = arith.constant 1 : index
    %c0_92 = arith.constant 0 : index
    %c0_93 = arith.constant 0 : index
    %289 = vector.load %arg6[%c1_91, %c0_92, %c0_93] : memref<3x2x320xf32, #tpu.memory_space<vmem>>, vector<1x2x320xf32>
    %290 = vector.shape_cast %289 : vector<1x2x320xf32> to vector<2x320xf32>
    %291 = vector.shape_cast %288 : vector<2x320xf32> to vector<1x2x320xf32>
    tpu.vector_store %arg6[%c1_91, %c0_92, %c0_93], %291 {strides = array<i32>} : memref<3x2x320xf32, #tpu.memory_space<vmem>>, vector<1x2x320xf32>,
    %292 = vector.extract_strided_slice %233 {offsets = [0, 0, 0], sizes = [2, 1, 320], strides = [1, 1, 1]} : vector<2x4x320xf32> to vector<2x1x320xf32>
    %293 = vector.shape_cast %292 : vector<2x1x320xf32> to vector<2x320xf32>
    %c8 = arith.constant 8 : index
    %c0_94 = arith.constant 0 : index
    %294 = memref.load %arg2[%c8, %c0_94] : memref<9x4xf32, #tpu.memory_space<smem>>
    %295 = vector.broadcast %294 : f32 to vector<2x320xf32>
    %296 = arith.mulf %293, %295 : vector<2x320xf32>
    %297 = vector.extract_strided_slice %233 {offsets = [0, 1, 0], sizes = [2, 1, 320], strides = [1, 1, 1]} : vector<2x4x320xf32> to vector<2x1x320xf32>
    %298 = vector.shape_cast %297 : vector<2x1x320xf32> to vector<2x320xf32>
    %c8_95 = arith.constant 8 : index
    %c1_96 = arith.constant 1 : index
    %299 = memref.load %arg2[%c8_95, %c1_96] : memref<9x4xf32, #tpu.memory_space<smem>>
    %300 = vector.broadcast %299 : f32 to vector<2x320xf32>
    %301 = arith.mulf %298, %300 : vector<2x320xf32>
    %302 = arith.addf %296, %301 : vector<2x320xf32>
    %303 = vector.extract_strided_slice %233 {offsets = [0, 2, 0], sizes = [2, 1, 320], strides = [1, 1, 1]} : vector<2x4x320xf32> to vector<2x1x320xf32>
    %304 = vector.shape_cast %303 : vector<2x1x320xf32> to vector<2x320xf32>
    %c8_97 = arith.constant 8 : index
    %c2_98 = arith.constant 2 : index
    %305 = memref.load %arg2[%c8_97, %c2_98] : memref<9x4xf32, #tpu.memory_space<smem>>
    %306 = vector.broadcast %305 : f32 to vector<2x320xf32>
    %307 = arith.mulf %304, %306 : vector<2x320xf32>
    %308 = arith.addf %302, %307 : vector<2x320xf32>
    %309 = vector.extract_strided_slice %233 {offsets = [0, 3, 0], sizes = [2, 1, 320], strides = [1, 1, 1]} : vector<2x4x320xf32> to vector<2x1x320xf32>
    %310 = vector.shape_cast %309 : vector<2x1x320xf32> to vector<2x320xf32>
    %c8_99 = arith.constant 8 : index
    %c3_100 = arith.constant 3 : index
    %311 = memref.load %arg2[%c8_99, %c3_100] : memref<9x4xf32, #tpu.memory_space<smem>>
    %312 = vector.broadcast %311 : f32 to vector<2x320xf32>
    %313 = arith.mulf %310, %312 : vector<2x320xf32>
    %314 = arith.addf %308, %313 : vector<2x320xf32>
    %c8_101 = arith.constant 8 : index
    %315 = memref.load %arg3[%c8_101] : memref<9xf32, #tpu.memory_space<smem>>
    %316 = vector.broadcast %315 : f32 to vector<2x320xf32>
    %317 = arith.addf %314, %316 : vector<2x320xf32>
    %c2_102 = arith.constant 2 : index
    %c0_103 = arith.constant 0 : index
    %c0_104 = arith.constant 0 : index
    %318 = vector.load %arg6[%c2_102, %c0_103, %c0_104] : memref<3x2x320xf32, #tpu.memory_space<vmem>>, vector<1x2x320xf32>
    %319 = vector.shape_cast %318 : vector<1x2x320xf32> to vector<2x320xf32>
    %320 = vector.shape_cast %317 : vector<2x320xf32> to vector<1x2x320xf32>
    tpu.vector_store %arg6[%c2_102, %c0_103, %c0_104], %320 {strides = array<i32>} : memref<3x2x320xf32, #tpu.memory_space<vmem>>, vector<1x2x320xf32>,
    return
  }
}

</mosaic_0001>

<bundles_post_ra>
// kernel: l2g_classifier_2d_forward.1
= control target key start
LH: loop header
LB: loop body
LE: loop exit
PB: predicated region body
PF: predicated region fallthrough
CT: control target
= control target key end

     0   :  { %12 = vsyncpa [#allocation3], 0  ;;  %s3510_s0 = inlined_call_operand.vmem [shape: f32[2,4,404], index: 0, kind: input, shape index: {}]   ;;  %s3511_s1 = inlined_call_operand.vmem [shape: f32[1,1,404], index: 1, kind: input, shape index: {}]   ;;  %s3512_s2 = inlined_call_operand.vmem [shape: f32[9,4], index: 2, kind: input, shape index: {}]   ;;  %s3513_s3 = inlined_call_operand.vmem [shape: f32[9], index: 3, kind: input, shape index: {}]   ;;  %s3514_s4 = inlined_call_operand.vmem [shape: f32[3,2,320], index: 4, kind: output, shape index: {0}]   ;;  %s3515_s5 = inlined_call_operand.vmem [shape: f32[3,2,320], index: 5, kind: output, shape index: {1}]   ;;  %s3516_s6 = inlined_call_operand.vmem [shape: f32[3,2,320], index: 6, kind: output, shape index: {2}]  }
   0x1   :  { %s23_s23 = sshll.u32 %s3512_s2, 4  ;;  %s24_s23 = int_to_ptr.vmem [resolvable:$true] %s23_s23 }
   0x2   :  { %13 = vsyncpa [#allocation5], 0  ;;  %s36_s26 = sshll.u32 %s3513_s3, 4  ;;  %s2118_s27 = scalar_lea.vmem %s24_s23, 256  ;;  %s37_s26 = int_to_ptr.vmem [resolvable:$true] %s36_s26 }
   0x3   :  { %p2119_p0 = scmp.ne.s32.totalorder %s24_s23, %s2118_s27  ;;  %p2123_p1 = scmp.lt.s32.totalorder %s24_s23, %s24_s23 }
   0x4   :  { %p2124_p2 = scmp.lt.s32.totalorder %s2118_s27, %s2118_s27 }
   0x6   :  { %p2125_p3 = por %p2124_p2, %p2123_p1 }
   0x8   :  { %p2126_p4 = pnand %p2125_p3, %p2119_p0 }
   0xa   :  { %2129 = shalt.err (!%p2126_p4)
}
   0xb   :  { %s2146_s28 = smov [#allocation2]   ;;  %s2147_s29 = smov 128  }
   0xc   :  { %s2148_s30 = smov 8   ;;  %s2130_s7 = scalar_lea.vmem %s37_s26, 16 }
   0xd   :  { %29 = dma.vmem_to_smem %s24_s23, 256, %s2146_s28, [#allocation3], %s2147_s29, %s2147_s29, %s2148_s30  }
   0xe   :  { %p2131_p5 = scmp.ne.s32.totalorder %s37_s26, %s2130_s7  ;;  %p2135_p6 = scmp.lt.s32.totalorder %s37_s26, %s37_s26 }
   0xf   :  { %p2136_p7 = scmp.lt.s32.totalorder %s2130_s7, %s2130_s7 }
  0x11   :  { %p2137_p8 = por %p2136_p7, %p2135_p6 }
  0x13   :  { %p2138_p9 = pnand %p2137_p8, %p2131_p5 }
  0x15   :  { %2141 = shalt.err (!%p2138_p9)
}
  0x16   :  { %s2149_s2 = smov [#allocation4]  }
  0x17   :  { %39 = dma.vmem_to_smem %s37_s26, 16, %s2149_s2, [#allocation5]  }
  0x18   :  { %2142 = dma.done.wait [#allocation3], 256  }
  0x19   :  { %2143 = vsyncadd [#allocation3], 4294967040 }
  0x1a   :  { %2144 = dma.done.wait [#allocation5], 16  }
  0x1b   :  { %2145 = vsyncadd [#allocation5], 4294967280 }
  0x1c   :  { %46 = sfence }
  0x1d   :  { %v2203_v0 = vld [vmem:[%s3510_s0 + $0x10] sm:$0xff]  ;;  %v2208_v1 = vld [vmem:[%s3510_s0] sm:$0xff]  ;;  %s2150_s11 = smov 127   ;;  %v2217_v2 = vld [vmem:[%s3510_s0 + $0x18] sm:$0xff]  ;;  %v368_v4 = vlaneseq  ;;  %s2151_s16 = smov 126   ;;  %vm68_vm0 = vcmask 1043456  }
  0x1e   :  { %60 = vrot.lane.b32.xlu1 %v2203_v0, %s2150_s11  ;;  %56 = vrot.lane.b32.xlu0 %v2208_v1, %s2150_s11  ;;  %v2222_v3 = vld [vmem:[%s3510_s0 + $0x8] sm:$0xff]  ;;  %v51_v8 = vld [vmem:[%s3511_s1] sm:$0xf]  ;;  %s2152_s18 = smov 125   ;;  %s2153_s1 = smov 124   ;;  %vm70_vm1 = vcmask 1039360  }
  0x1f   :  { %v2232_v5 = vshrl.u32 %v368_v4, 7  ;;  %vm97_vm2 = vcmask 1031168   ;;  %vm124_vm3 = vcmask 1022976   ;;  %vm151_vm4 = vcmask 1014784   ;;  %s2154_s19 = smov 108   ;;  %s2155_s20 = smov 88  }
  0x20   :  { %s2156_s21 = smov 68   ;;  %s2157_s22 = smov 48   ;;  %vm182_vm5 = vcmask 883712   ;;  %vm207_vm6 = vcmask 719872   ;;  %vm232_vm7 = vcmask 556032   ;;  %vm257_vm8 = vcmask 392192  }
  0x21   :  { %v686_v6 = vsub.s32 0, %v2232_v5  ;;  %v690_v7 = vsub.s32 1, %v2232_v5  ;;  %v694_v11 = vsub.s32 2, %v2232_v5  ;;  %v698_v12 = vsub.s32 3, %v2232_v5  ;;  %s2675_s23 = sld [smem:[#allocation2]]  ;;  %s2677_s24 = sld [smem:[#allocation2 + $0x1]] }
  0x22   :  { %62 = vrot.lane.b32.xlu1 %v2217_v2, %s2150_s11  ;;  %58 = vrot.lane.b32.xlu0 %v2222_v3, %s2150_s11  ;;  %s2681_s25 = sld [smem:[#allocation2 + $0x2]]  ;;  %s2683_s26 = sld [smem:[#allocation2 + $0x3]]  ;;  %vm409_vm9 = vcmask 1041408   ;;  %vm410_vm10 = vcmask 1043458   ;;  %vm400_vm11 = vcmask 1041409   ;;  %vm402_vm12 = vcmask 1043459  }
  0x23   :  { %v687_v9 = vrot.slane %v51_v8, %v686_v6  ;;  %v691_v10 = vrot.slane %v51_v8, %v690_v7  ;;  %v695_v14 = vrot.slane %v51_v8, %v694_v11  ;;  %v699_v15 = vrot.slane %v51_v8, %v698_v12  ;;  %s2687_s27 = sld [smem:[#allocation2 + $0x80]]  ;;  %s2689_s28 = sld [smem:[#allocation2 + $0x81]] }
  0x24   :  { %s2692_s29 = sld [smem:[#allocation4]]  ;;  %s2694_s30 = sld [smem:[#allocation2 + $0x82]]  ;;  %vm412_vm13 = vcmask 521220   ;;  %vm404_vm14 = vcmask 1045509   ;;  %vm406_vm15 = vcmask 1047559  }
  0x25   :  { %v700_v13 = vcombine.low %v687_v9, %v691_v10  ;;  %v701_v17 = vcombine.low %v695_v14, %v699_v15  ;;  %s2697_s7 = sld [smem:[#allocation2 + $0x83]]  ;;  %s2699_s2 = sld [smem:[#allocation4 + $0x1]] }
  0x26   :  { %86 = vrot.lane.b32.xlu1 %v2222_v3, %s2151_s16  ;;  %84 = vrot.lane.b32.xlu0 %v2208_v1, %s2151_s16  ;;  %s2706_s3 = sld [smem:[#allocation2 + $0x100]]  ;;  %s2708_s8 = sld [smem:[#allocation2 + $0x101]] }
  0x27   :  { %v2258_v16 = vadd.f32 %v700_v13, %v2203_v0  ;;  %v2265_v18 = vsub.f32 %v2203_v0, %v700_v13  ;;  %v2268_v19 = vadd.f32 %v701_v17, %v2217_v2  ;;  %v2275_v20 = vsub.f32 %v2217_v2, %v701_v17  ;;  %s2710_s9 = sld [smem:[#allocation2 + $0x102]]  ;;  %s2712_s10 = sld [smem:[#allocation2 + $0x103]] }
  0x28   :  { %v2278_v21 = vadd.f32 %v700_v13, %v2208_v1  ;;  %v2285_v22 = vadd.f32 %v701_v17, %v2222_v3  ;;  %v2292_v23 = vsub.f32 %v2208_v1, %v700_v13  ;;  %v2299_v24 = vsub.f32 %v2222_v3, %v701_v17  ;;  %s2716_s12 = sld [smem:[#allocation2 + $0x180]]  ;;  %s2722_s13 = sld [smem:[#allocation2 + $0x181]] }
  0x29   :  { %s2724_s14 = sld [smem:[#allocation2 + $0x182]]  ;;  %s2729_s15 = sld [smem:[#allocation2 + $0x183]] }
  0x2a   :  { %90 = vrot.lane.b32.xlu1 %v2217_v2, %s2151_s16  ;;  %88 = vrot.lane.b32.xlu0 %v2203_v0, %s2151_s16  ;;  %s2735_s0 = sld [smem:[#allocation2 + $0x201]]  ;;  %s2737_s17 = sld [smem:[#allocation2 + $0x202]] }
  0x2e   :  { %113 = vrot.lane.b32.xlu1 %v2222_v3, %s2152_s18  ;;  %111 = vrot.lane.b32.xlu0 %v2208_v1, %s2152_s18 }
  0x32   :  { %117 = vrot.lane.b32.xlu1 %v2217_v2, %s2152_s18  ;;  %115 = vrot.lane.b32.xlu0 %v2203_v0, %s2152_s18 }
  0x36   :  { %140 = vrot.lane.b32.xlu1 %v2222_v3, %s2153_s1  ;;  %138 = vrot.lane.b32.xlu0 %v2208_v1, %s2153_s1 }
  0x3a   :  { %716 = vrot.lane.b32.xlu1 %v2258_v16, %s2150_s11  ;;  %142 = vrot.lane.b32.xlu0 %v2203_v0, %s2153_s1 }
  0x3e   :  { %1331 = vrot.lane.b32.xlu1 %v2265_v18, %s2150_s11  ;;  %718 = vrot.lane.b32.xlu0 %v2268_v19, %s2150_s11 }
  0x42   :  { %1333 = vrot.lane.b32.xlu0 %v2275_v20, %s2150_s11  ;;  %712 = vrot.lane.b32.xlu1 %v2278_v21, %s2150_s11 }
  0x46   :  { %714 = vrot.lane.b32.xlu0 %v2285_v22, %s2150_s11  ;;  %742 = vrot.lane.b32.xlu1 %v2258_v16, %s2151_s16 }
  0x4a   :  { %744 = vrot.lane.b32.xlu0 %v2268_v19, %s2151_s16  ;;  %1327 = vrot.lane.b32.xlu1 %v2292_v23, %s2150_s11 }
  0x4e   :  { %1329 = vrot.lane.b32.xlu0 %v2299_v24, %s2150_s11  ;;  %1357 = vrot.lane.b32.xlu1 %v2265_v18, %s2151_s16  ;;  %s2714_s11 = sld [smem:[#allocation4 + $0x2]] }
  0x52   :  { %1359 = vrot.lane.b32.xlu0 %v2275_v20, %s2151_s16  ;;  %738 = vrot.lane.b32.xlu1 %v2278_v21, %s2151_s16 }
  0x56   :  { %740 = vrot.lane.b32.xlu0 %v2285_v22, %s2151_s16  ;;  %768 = vrot.lane.b32.xlu1 %v2258_v16, %s2152_s18 }
  0x5a   :  { %770 = vrot.lane.b32.xlu0 %v2268_v19, %s2152_s18  ;;  %1353 = vrot.lane.b32.xlu1 %v2292_v23, %s2151_s16 }
  0x5e   :  { %1355 = vrot.lane.b32.xlu0 %v2299_v24, %s2151_s16  ;;  %1383 = vrot.lane.b32.xlu1 %v2265_v18, %s2152_s18  ;;  %s2731_s16 = sld [smem:[#allocation2 + $0x200]] }
  0x62   :  { %1385 = vrot.lane.b32.xlu0 %v2275_v20, %s2152_s18  ;;  %144 = vrot.lane.b32.xlu1 %v2217_v2, %s2153_s1 }
  0x66   :  { %764 = vrot.lane.b32.xlu0 %v2278_v21, %s2152_s18  ;;  %766 = vrot.lane.b32.xlu1 %v2285_v22, %s2152_s18 }
  0x6a   :  { %794 = vrot.lane.b32.xlu0 %v2258_v16, %s2153_s1  ;;  %796 = vrot.lane.b32.xlu1 %v2268_v19, %s2153_s1 }
  0x6e   :  { %1379 = vrot.lane.b32.xlu0 %v2292_v23, %s2152_s18  ;;  %1381 = vrot.lane.b32.xlu1 %v2299_v24, %s2152_s18  ;;  %s2739_s18 = sld [smem:[#allocation2 + $0x203]] }
  0x72   :  { %1409 = vrot.lane.b32.xlu0 %v2265_v18, %s2153_s1  ;;  %1411 = vrot.lane.b32.xlu1 %v2275_v20, %s2153_s1 }
  0x76   :  { %790 = vrot.lane.b32.xlu0 %v2278_v21, %s2153_s1  ;;  %792 = vrot.lane.b32.xlu1 %v2285_v22, %s2153_s1 }
  0x7a   :  { %1405 = vrot.lane.b32.xlu0 %v2292_v23, %s2153_s1  ;;  %1407 = vrot.lane.b32.xlu1 %v2299_v24, %s2153_s1  ;;  %s2741_s1 = sld [smem:[#allocation2 + $0x280]] }
  0x90   :  { %v2349_v25 = vpop.permute.xlu1 %60  ;;  %v57_v26 = vpop.permute.xlu0 %56 }
  0x91   :  { %v64_v33 = vrot.slane %v57_v26, 4 }
  0x94   :  { %v2351_v27 = vpop.permute.xlu1 %62  ;;  %v59_v28 = vpop.permute.xlu0 %58 }
  0x95   :  { %v65_v34 = vrot.slane %v59_v28, 4 }
  0x97   :  { %v69_v39 = vsel %vm68_vm0, %v64_v33, %v65_v34  ;;  %v72_v40 = vsel %vm70_vm1, %v59_v28, %v65_v34 }
  0x98   :  { %v87_v29 = vpop.permute.xlu1 %86  ;;  %v85_v30 = vpop.permute.xlu0 %84  ;;  %v81_v44 = vadd.f32 %v72_v40, %v2222_v3  ;;  %v71_v45 = vsel %vm70_vm1, %v57_v26, %v69_v39 }
  0x99   :  { %v93_v35 = vrot.slane %v87_v29, 4  ;;  %v92_v36 = vrot.slane %v85_v30, 4  ;;  %v80_v51 = vadd.f32 %v71_v45, %v2208_v1 }
  0x9b   :  { %v96_v43 = vsel %vm68_vm0, %v92_v36, %v93_v35  ;;  %v99_v48 = vsel %vm97_vm2, %v87_v29, %v93_v35 }
  0x9c   :  { %v2353_v31 = vpop.permute.xlu1 %90  ;;  %v2355_v32 = vpop.permute.xlu0 %88  ;;  %v98_v50 = vsel %vm97_vm2, %v85_v30, %v96_v43  ;;  %v108_v53 = vadd.f32 %v99_v48, %v81_v44 }
  0x9d   :  { %v107_v57 = vadd.f32 %v98_v50, %v80_v51 }
  0xa0   :  { %v114_v37 = vpop.permute.xlu1 %113  ;;  %v112_v38 = vpop.permute.xlu0 %111 }
  0xa1   :  { %v120_v41 = vrot.slane %v114_v37, 4  ;;  %v119_v42 = vrot.slane %v112_v38, 4 }
  0xa3   :  { %v123_v49 = vsel %vm68_vm0, %v119_v42, %v120_v41  ;;  %v126_v52 = vsel %vm124_vm3, %v114_v37, %v120_v41 }
  0xa4   :  { %v2362_v46 = vpop.permute.xlu1 %117  ;;  %v2364_v47 = vpop.permute.xlu0 %115  ;;  %v125_v54 = vsel %vm124_vm3, %v112_v38, %v123_v49  ;;  %v135_v60 = vadd.f32 %v126_v52, %v108_v53  ;;  %v67_v49 = vrot.slane %v2351_v27, 4 }
  0xa5   :  { %v134_v61 = vadd.f32 %v125_v54, %v107_v57  ;;  %v66_v57 = vrot.slane %v2349_v25, 4 }
  0xa8   :  { %v141_v55 = vpop.permute.xlu1 %140  ;;  %v139_v56 = vpop.permute.xlu0 %138 }
  0xa9   :  { %v147_v58 = vrot.slane %v141_v55, 4  ;;  %v146_v59 = vrot.slane %v139_v56, 4 }
  0xab   :  { %v153_v62 = vsel %vm151_vm4, %v141_v55, %v147_v58  ;;  %v150_v63 = vsel %vm68_vm0, %v146_v59, %v147_v58  ;;  %v95_v58 = vrot.slane %v2353_v31, 4  ;;  %v94_v59 = vrot.slane %v2355_v32, 4 }
  0xac   :  { %v2374_v3 = vadd.f32 %v153_v62, %v135_v60  ;;  %v152_v1 = vsel %vm151_vm4, %v139_v56, %v150_v63  ;;  %v2377_v4 = vpop.permute.xlu1 %716  ;;  %v2379_v6 = vpop.permute.xlu0 %142 }
  0xad   :  { %v2381_v7 = vadd.f32 %v152_v1, %v134_v61 }
  0xae   :  { %171 = vrot.lane.b32.xlu1 %v2374_v3, %s2154_s19 }
  0xaf   :  { %169 = vrot.lane.b32.xlu0 %v2381_v7, %s2154_s19 }
  0xb0   :  { %v1332_v8 = vpop.permute.xlu1 %1331  ;;  %v2387_v9 = vpop.permute.xlu0 %718 }
  0xb1   :  { %v1337_v26 = vrot.slane %v1332_v8, 4 }
  0xb4   :  { %v1334_v10 = vpop.permute.xlu0 %1333  ;;  %v713_v11 = vpop.permute.xlu1 %712 }
  0xb5   :  { %v1338_v17 = vrot.slane %v1334_v10, 4  ;;  %v720_v35 = vrot.slane %v713_v11, 4 }
  0xb7   :  { %v1342_v30 = vsel %vm68_vm0, %v1337_v26, %v1338_v17  ;;  %v1344_v34 = vsel %vm70_vm1, %v1334_v10, %v1338_v17  ;;  %v122_v26 = vrot.slane %v2362_v46, 4 }
  0xb8   :  { %v715_v12 = vpop.permute.xlu0 %714  ;;  %v2389_v13 = vpop.permute.xlu1 %742  ;;  %v1343_v36 = vsel %vm70_vm1, %v1332_v8, %v1342_v30  ;;  %v1352_v42 = vmin.f32 %v2275_v20, %v1344_v34  ;;  %v73_v8 = vsel %vm68_vm0, %v66_v57, %v67_v49  ;;  %v75_v30 = vsel %vm70_vm1, %v2351_v27, %v67_v49 }
  0xb9   :  { %v721_v33 = vrot.slane %v715_v12, 4  ;;  %v1351_v43 = vmin.f32 %v2265_v18, %v1343_v36  ;;  %v100_v34 = vsel %vm68_vm0, %v94_v59, %v95_v58  ;;  %v83_v27 = vadd.f32 %v75_v30, %v2217_v2 }
  0xbb   :  { %v724_v39 = vsel %vm68_vm0, %v720_v35, %v721_v33  ;;  %v726_v44 = vsel %vm70_vm1, %v715_v12, %v721_v33  ;;  %v74_v33 = vsel %vm70_vm1, %v2349_v25, %v73_v8 }
  0xbc   :  { %v2391_v14 = vpop.permute.xlu0 %744  ;;  %v1328_v15 = vpop.permute.xlu1 %1327  ;;  %v725_v50 = vsel %vm70_vm1, %v713_v11, %v724_v39  ;;  %v735_v60 = vmax.f32 %v2285_v22, %v726_v44  ;;  %v121_v22 = vrot.slane %v2364_v47, 4  ;;  %v102_v39 = vsel %vm97_vm2, %v2353_v31, %v95_v58 }
  0xbd   :  { %v734_v61 = vmax.f32 %v2278_v21, %v725_v50  ;;  %v1335_v62 = vrot.slane %v1328_v15, 4  ;;  %v82_v25 = vadd.f32 %v74_v33, %v2203_v0 }
  0xc0   :  { %v1330_v28 = vpop.permute.xlu0 %1329  ;;  %v1358_v29 = vpop.permute.xlu1 %1357 }
  0xc1   :  { %v1363_v40 = vrot.slane %v1358_v29, 4  ;;  %v1336_v20 = vrot.slane %v1330_v28, 4 }
  0xc3   :  { %v1339_v21 = vsel %vm68_vm0, %v1335_v62, %v1336_v20  ;;  %v1341_v35 = vsel %vm70_vm1, %v1330_v28, %v1336_v20  ;;  %v722_v62 = vrot.slane %v2377_v4, 4 }
  0xc4   :  { %v1360_v37 = vpop.permute.xlu0 %1359  ;;  %v739_v38 = vpop.permute.xlu1 %738  ;;  %v1340_v36 = vsel %vm70_vm1, %v1328_v15, %v1339_v21  ;;  %v1350_v28 = vmin.f32 %v2299_v24, %v1341_v35  ;;  %v129_v15 = vsel %vm124_vm3, %v2362_v46, %v122_v26  ;;  %v148_v46 = vrot.slane %v2379_v6, 4 }
  0xc5   :  { %v1364_v41 = vrot.slane %v1360_v37, 4  ;;  %v746_v18 = vrot.slane %v739_v38, 4  ;;  %v1349_v44 = vmin.f32 %v2292_v23, %v1340_v36 }
  0xc7   :  { %v1368_v45 = vsel %vm68_vm0, %v1363_v40, %v1364_v41  ;;  %v1370_v48 = vsel %vm97_vm2, %v1360_v37, %v1364_v41  ;;  %v127_v40 = vsel %vm68_vm0, %v121_v22, %v122_v26 }
  0xc8   :  { %v1369_v51 = vsel %vm97_vm2, %v1358_v29, %v1368_v45  ;;  %v2405_v52 = vmin.f32 %v1352_v42, %v1370_v48  ;;  %v741_v53 = vpop.permute.xlu0 %740  ;;  %v2407_v54 = vpop.permute.xlu1 %768  ;;  %v110_v48 = vadd.f32 %v102_v39, %v83_v27  ;;  %v128_v2 = vsel %vm124_vm3, %v2364_v47, %v127_v40 }
  0xc9   :  { %v2409_v55 = vmin.f32 %v1351_v43, %v1369_v51  ;;  %v747_v56 = vrot.slane %v741_v53, 4  ;;  %v101_v43 = vsel %vm97_vm2, %v2355_v32, %v100_v34  ;;  %v723_v47 = vrot.slane %v2387_v9, 4 }
  0xca   :  { %v109_v50 = vadd.f32 %v101_v43, %v82_v25  ;;  %v774_v30 = vrot.slane %v2407_v54, 4 }
  0xcb   :  { %v750_v63 = vsel %vm68_vm0, %v746_v18, %v747_v56  ;;  %v752_v1 = vsel %vm97_vm2, %v741_v53, %v747_v56  ;;  %v137_v53 = vadd.f32 %v129_v15, %v110_v48  ;;  %v729_v26 = vsel %vm70_vm1, %v2387_v9, %v723_v47 }
  0xcc   :  { %v751_v10 = vsel %vm97_vm2, %v739_v38, %v750_v63  ;;  %v2420_v11 = vmax.f32 %v735_v60, %v752_v1  ;;  %v2422_v12 = vpop.permute.xlu0 %770  ;;  %v1354_v17 = vpop.permute.xlu1 %1353  ;;  %v136_v20 = vadd.f32 %v128_v2, %v109_v50  ;;  %v749_v63 = vrot.slane %v2391_v14, 4 }
  0xcd   :  { %v2427_v29 = vmax.f32 %v734_v61, %v751_v10  ;;  %v1361_v41 = vrot.slane %v1354_v17, 4  ;;  %v748_v1 = vrot.slane %v2389_v13, 4 }
  0xce   :  { %v755_v35 = vsel %vm97_vm2, %v2391_v14, %v749_v63 }
  0xcf   :  { %v753_v22 = vsel %vm68_vm0, %v748_v1, %v749_v63 }
  0xd0   :  { %v1356_v37 = vpop.permute.xlu0 %1355  ;;  %v2436_v38 = vpop.permute.xlu1 %1383  ;;  %v754_v39 = vsel %vm97_vm2, %v2389_v13, %v753_v22 }
  0xd1   :  { %v1362_v42 = vrot.slane %v1356_v37, 4  ;;  %v1389_v27 = vrot.slane %v2436_v38, 4 }
  0xd3   :  { %v1365_v31 = vsel %vm68_vm0, %v1361_v41, %v1362_v42  ;;  %v1367_v45 = vsel %vm97_vm2, %v1356_v37, %v1362_v42  ;;  %v737_v37 = vmax.f32 %v2268_v19, %v729_v26 }
  0xd4   :  { %v1366_v0 = vsel %vm97_vm2, %v1354_v17, %v1365_v31  ;;  %v2454_v49 = vmin.f32 %v1350_v28, %v1367_v45  ;;  %v2456_v32 = vpop.permute.xlu0 %1385  ;;  %v145_v24 = vpop.permute.xlu1 %144  ;;  %v775_v17 = vrot.slane %v2422_v12, 4 }
  0xd5   :  { %v2459_v51 = vmin.f32 %v1349_v44, %v1366_v0  ;;  %v149_v23 = vrot.slane %v145_v24, 4  ;;  %v1390_v40 = vrot.slane %v2456_v32, 4  ;;  %v763_v42 = vmax.f32 %v737_v37, %v755_v35 }
  0xd6   :  { %v781_v14 = vsel %vm124_vm3, %v2422_v12, %v775_v17 }
  0xd7   :  { %v154_v18 = vsel %vm68_vm0, %v148_v46, %v149_v23  ;;  %v156_v56 = vsel %vm151_vm4, %v145_v24, %v149_v23  ;;  %v1394_v44 = vsel %vm68_vm0, %v1389_v27, %v1390_v40  ;;  %v789_v48 = vmax.f32 %v763_v42, %v781_v14 }
  0xd8   :  { %v155_v57 = vsel %vm151_vm4, %v2379_v6, %v154_v18  ;;  %v2466_v58 = vadd.f32 %v156_v56, %v137_v53  ;;  %v2468_v59 = vpop.permute.xlu0 %764  ;;  %v2470_v60 = vpop.permute.xlu1 %766  ;;  %v727_v6 = vsel %vm68_vm0, %v722_v62, %v723_v47  ;;  %v1396_v0 = vsel %vm124_vm3, %v2456_v32, %v1390_v40 }
  0xd9   :  { %v2472_v61 = vadd.f32 %v155_v57, %v136_v20  ;;  %v728_v21 = vsel %vm70_vm1, %v2377_v4, %v727_v6  ;;  %v779_v4 = vsel %vm68_vm0, %v774_v30, %v775_v17  ;;  %v773_v43 = vrot.slane %v2470_v60, 4  ;;  %vm411_vm1 = vmor %vm410_vm10, %vm409_vm9 }
  0xda   :  { %175 = vrot.lane.b32.xlu1 %v2466_v58, %s2154_s19  ;;  %v736_v41 = vmax.f32 %v2258_v16, %v728_v21  ;;  %v780_v25 = vsel %vm124_vm3, %v2407_v54, %v779_v4  ;;  %v772_v16 = vrot.slane %v2468_v59, 4  ;;  %v1395_v50 = vsel %vm124_vm3, %v2436_v38, %v1394_v44  ;;  %vm3304_vm2 = vmor %vm412_vm13, %vm411_vm1 }
  0xdb   :  { %173 = vrot.lane.b32.xlu0 %v2472_v61, %s2154_s19  ;;  %v1404_v57 = vmin.f32 %v2405_v52, %v1396_v0  ;;  %v1403_v38 = vmin.f32 %v2409_v55, %v1395_v50  ;;  %v778_v63 = vsel %vm124_vm3, %v2470_v60, %v773_v43 }
  0xdc   :  { %v795_v8 = vpop.permute.xlu0 %794  ;;  %v797_v10 = vpop.permute.xlu1 %796  ;;  %v762_v13 = vmax.f32 %v736_v41, %v754_v39  ;;  %v776_v46 = vsel %vm68_vm0, %v772_v16, %v773_v43  ;;  %v787_v22 = vmax.f32 %v2420_v11, %v778_v63 }
  0xdd   :  { %v800_v33 = vrot.slane %v795_v8, 4  ;;  %v801_v34 = vrot.slane %v797_v10, 4  ;;  %v777_v1 = vsel %vm124_vm3, %v2468_v59, %v776_v46 }
  0xde   :  { %200 = vrot.lane.b32.xlu1 %v2466_v58, %s2155_s20  ;;  %v788_v54 = vmax.f32 %v762_v13, %v780_v25  ;;  %v786_v59 = vmax.f32 %v2427_v29, %v777_v1 }
  0xdf   :  { %198 = vrot.lane.b32.xlu0 %v2472_v61, %s2155_s20  ;;  %v805_v19 = vsel %vm68_vm0, %v800_v33, %v801_v34  ;;  %v807_v12 = vsel %vm151_vm4, %v797_v10, %v801_v34 }
  0xe0   :  { %v2495_v9 = vpop.permute.xlu0 %1379  ;;  %v2497_v36 = vpop.permute.xlu1 %1381  ;;  %v806_v2 = vsel %vm151_vm4, %v795_v8, %v805_v19  ;;  %v2530_v23 = vmax.f32 %v789_v48, %v807_v12 }
  0xe1   :  { %v2532_v18 = vmax.f32 %v788_v54, %v806_v2  ;;  %v1387_v17 = vrot.slane %v2495_v9, 4  ;;  %v1388_v26 = vrot.slane %v2497_v36, 4 }
  0xe2   :  { %196 = vrot.lane.b32.xlu1 %v2374_v3, %s2155_s20 }
  0xe3   :  { %194 = vrot.lane.b32.xlu0 %v2381_v7, %s2155_s20  ;;  %v1391_v35 = vsel %vm68_vm0, %v1387_v17, %v1388_v26  ;;  %v1393_v11 = vsel %vm124_vm3, %v2497_v36, %v1388_v26 }
  0xe4   :  { %v1410_v28 = vpop.permute.xlu0 %1409  ;;  %v1412_v15 = vpop.permute.xlu1 %1411  ;;  %v1392_v29 = vsel %vm124_vm3, %v2495_v9, %v1391_v35  ;;  %v1402_v40 = vmin.f32 %v2454_v49, %v1393_v11 }
  0xe5   :  { %v1415_v31 = vrot.slane %v1410_v28, 4  ;;  %v1416_v45 = vrot.slane %v1412_v15, 4  ;;  %v1401_v42 = vmin.f32 %v2459_v51, %v1392_v29 }
  0xe6   :  { %225 = vrot.lane.b32.xlu1 %v2466_v58, %s2156_s21 }
  0xe7   :  { %v1420_v24 = vsel %vm68_vm0, %v1415_v31, %v1416_v45  ;;  %223 = vrot.lane.b32.xlu0 %v2472_v61, %s2156_s21  ;;  %v1422_v56 = vsel %vm151_vm4, %v1412_v15, %v1416_v45 }
  0xe8   :  { %v791_v53 = vpop.permute.xlu0 %790  ;;  %v793_v20 = vpop.permute.xlu1 %792  ;;  %v1421_v62 = vsel %vm151_vm4, %v1410_v28, %v1420_v24  ;;  %v2547_v8 = vmin.f32 %v1404_v57, %v1422_v56 }
  0xe9   :  { %v798_v47 = vrot.slane %v791_v53, 4  ;;  %v799_v32 = vrot.slane %v793_v20, 4  ;;  %v2551_v55 = vmin.f32 %v1403_v38, %v1421_v62 }
  0xea   :  { %826 = vrot.lane.b32.xlu1 %v2530_v23, %s2154_s19 }
  0xeb   :  { %v802_v6 = vsel %vm68_vm0, %v798_v47, %v799_v32  ;;  %824 = vrot.lane.b32.xlu0 %v2532_v18, %s2154_s19  ;;  %v804_v60 = vsel %vm151_vm4, %v793_v20, %v799_v32 }
  0xec   :  { %v1406_v52 = vpop.permute.xlu0 %1405  ;;  %v1408_v10 = vpop.permute.xlu1 %1407  ;;  %v803_v21 = vsel %vm151_vm4, %v791_v53, %v802_v6  ;;  %v2561_v34 = vmax.f32 %v787_v22, %v804_v60 }
  0xed   :  { %v1413_v30 = vrot.slane %v1406_v52, 4  ;;  %v1414_v33 = vrot.slane %v1408_v10, 4  ;;  %v2564_v37 = vmax.f32 %v786_v59, %v803_v21 }
  0xee   :  { %1441 = vrot.lane.b32.xlu1 %v2547_v8, %s2154_s19 }
  0xef   :  { %1439 = vrot.lane.b32.xlu0 %v2551_v55, %s2154_s19  ;;  %v1417_v39 = vsel %vm68_vm0, %v1413_v30, %v1414_v33  ;;  %v1419_v4 = vsel %vm151_vm4, %v1408_v10, %v1414_v33 }
  0xf0   :  { %v1418_v41 = vsel %vm151_vm4, %v1406_v52, %v1417_v39  ;;  %v2583_v36 = vmin.f32 %v1402_v40, %v1419_v4 }
  0xf1   :  { %v2585_v14 = vmin.f32 %v1401_v42, %v1418_v41 }
  0xf2   :  { %822 = vrot.lane.b32.xlu1 %v2561_v34, %s2154_s19 }
  0xf3   :  { %820 = vrot.lane.b32.xlu0 %v2564_v37, %s2154_s19 }
  0xf6   :  { %850 = vrot.lane.b32.xlu1 %v2530_v23, %s2155_s20 }
  0xf7   :  { %848 = vrot.lane.b32.xlu0 %v2532_v18, %s2155_s20 }
  0xfa   :  { %1437 = vrot.lane.b32.xlu1 %v2583_v36, %s2154_s19 }
  0xfb   :  { %1435 = vrot.lane.b32.xlu0 %v2585_v14, %s2154_s19  ;;  %s2748_s19 = sld [smem:[#allocation2 + $0x281]] }
  0xfe   :  { %1465 = vrot.lane.b32.xlu1 %v2547_v8, %s2155_s20 }
  0xff   :  { %1463 = vrot.lane.b32.xlu0 %v2551_v55, %s2155_s20 }
 0x102   :  { %846 = vrot.lane.b32.xlu1 %v2561_v34, %s2155_s20 }
 0x103   :  { %844 = vrot.lane.b32.xlu0 %v2564_v37, %s2155_s20 }
 0x106   :  { %874 = vrot.lane.b32.xlu1 %v2530_v23, %s2156_s21 }
 0x107   :  { %872 = vrot.lane.b32.xlu0 %v2532_v18, %s2156_s21 }
 0x10a   :  { %1461 = vrot.lane.b32.xlu1 %v2583_v36, %s2155_s20 }
 0x10b   :  { %1459 = vrot.lane.b32.xlu0 %v2585_v14, %s2155_s20  ;;  %s2750_s20 = sld [smem:[#allocation2 + $0x282]] }
 0x10e   :  { %1489 = vrot.lane.b32.xlu1 %v2547_v8, %s2156_s21 }
 0x10f   :  { %1487 = vrot.lane.b32.xlu0 %v2551_v55, %s2156_s21 }
 0x112   :  { %221 = vrot.lane.b32.xlu1 %v2374_v3, %s2156_s21 }
 0x113   :  { %219 = vrot.lane.b32.xlu0 %v2381_v7, %s2156_s21 }
 0x116   :  { %250 = vrot.lane.b32.xlu1 %v2466_v58, %s2157_s22 }
 0x117   :  { %248 = vrot.lane.b32.xlu0 %v2472_v61, %s2157_s22 }
 0x11a   :  { %870 = vrot.lane.b32.xlu1 %v2561_v34, %s2156_s21 }
 0x11b   :  { %868 = vrot.lane.b32.xlu0 %v2564_v37, %s2156_s21 }
 0x11e   :  { %898 = vrot.lane.b32.xlu1 %v2530_v23, %s2157_s22 }
 0x11f   :  { %896 = vrot.lane.b32.xlu0 %v2532_v18, %s2157_s22 }
 0x120   :  { %v172_v49 = vpop.permute.xlu1 %171 }
 0x121   :  { %v178_v51 = vrot.slane %v172_v49, 4  ;;  %v170_v9 = vpop.permute.xlu0 %169  ;;  %v191_v0 = vadd.f32 %v172_v49, %v2374_v3 }
 0x122   :  { %v177_v27 = vrot.slane %v170_v9, 4  ;;  %1485 = vrot.lane.b32.xlu1 %v2583_v36, %s2156_s21 }
 0x123   :  { %1483 = vrot.lane.b32.xlu0 %v2585_v14, %s2156_s21  ;;  %s2766_s21 = sld [smem:[#allocation4 + $0x3]] }
 0x124   :  { %v181_v19 = vsel %vm68_vm0, %v177_v27, %v178_v51 }
 0x125   :  { %v183_v13 = vsel %vm182_vm5, %v170_v9, %v181_v19 }
 0x126   :  { %1513 = vrot.lane.b32.xlu1 %v2547_v8, %s2157_s22  ;;  %v190_v57 = vadd.f32 %v183_v13, %v2381_v7 }
 0x127   :  { %1511 = vrot.lane.b32.xlu0 %v2551_v55, %s2157_s22 }
 0x12a   :  { %246 = vrot.lane.b32.xlu1 %v2374_v3, %s2157_s22 }
 0x12b   :  { %244 = vrot.lane.b32.xlu0 %v2381_v7, %s2157_s22 }
 0x12e   :  { %894 = vrot.lane.b32.xlu1 %v2561_v34, %s2157_s22 }
 0x12f   :  { %892 = vrot.lane.b32.xlu0 %v2564_v37, %s2157_s22 }
 0x132   :  { %1509 = vrot.lane.b32.xlu1 %v2583_v36, %s2157_s22 }
 0x133   :  { %1507 = vrot.lane.b32.xlu0 %v2585_v14, %s2157_s22  ;;  %s2768_s22 = sld [smem:[#allocation2 + $0x283]] }
 0x14c   :  { %v176_v25 = vpop.permute.xlu1 %175 }
 0x14d   :  { %v180_v16 = vrot.slane %v176_v25, 4  ;;  %v174_v43 = vpop.permute.xlu0 %173  ;;  %v193_v15 = vadd.f32 %v176_v25, %v2466_v58 }
 0x14e   :  { %v179_v28 = vrot.slane %v174_v43, 4 }
 0x150   :  { %v184_v44 = vsel %vm68_vm0, %v179_v28, %v180_v16  ;;  %v201_v12 = vpop.permute.xlu1 %200 }
 0x151   :  { %v185_v31 = vsel %vm182_vm5, %v174_v43, %v184_v44  ;;  %v205_v45 = vrot.slane %v201_v12, 4  ;;  %v218_v48 = vadd.f32 %v201_v12, %v193_v15  ;;  %v199_v2 = vpop.permute.xlu0 %198 }
 0x152   :  { %v204_v54 = vrot.slane %v199_v2, 4  ;;  %v192_v24 = vadd.f32 %v185_v31, %v2472_v61 }
 0x154   :  { %v209_v50 = vsel %vm68_vm0, %v204_v54, %v205_v45  ;;  %v197_v46 = vpop.permute.xlu1 %196 }
 0x155   :  { %v210_v53 = vsel %vm207_vm6, %v199_v2, %v209_v50  ;;  %v203_v58 = vrot.slane %v197_v46, 4  ;;  %v2644_v20 = vadd.f32 %v197_v46, %v191_v0  ;;  %v195_v56 = vpop.permute.xlu0 %194  ;;  %v2158_v2 = vmov 1983009808  }
 0x156   :  { %v217_v47 = vadd.f32 %v210_v53, %v192_v24  ;;  %v202_v32 = vrot.slane %v195_v56, 4  ;;  %v366_v54 = vunpack.c.l.s4 %v2158_v2  ;;  %v2867_v2 = vstv %s2750_s20 }
 0x157   :  { %3595 = vst [vmem:[#allocation23_spill] sm:$0xff] %v2867_v2 }
 0x158   :  { %v206_v62 = vsel %vm68_vm0, %v202_v32, %v203_v58  ;;  %v226_v38 = vpop.permute.xlu1 %225 }
 0x159   :  { %v208_v3 = vsel %vm207_vm6, %v195_v56, %v206_v62  ;;  %v230_v63 = vrot.slane %v226_v38, 4  ;;  %v2649_v61 = vadd.f32 %v226_v38, %v218_v48  ;;  %v224_v6 = vpop.permute.xlu0 %223  ;;  %v367_v56 = vunpack.c.0.s8 %v366_v54 }
 0x15a   :  { %v2651_v1 = vadd.f32 %v208_v3, %v190_v57  ;;  %v229_v52 = vrot.slane %v224_v6, 4 }
 0x15b   :  { %v2744_v3 = vsub.s32 %v367_v56, %v2232_v5  ;;  %v2771_v5 = vstv %s2692_s29  ;;  %s2825_s29 = sld [smem:[#allocation2 + $0x380]] }
 0x15c   :  { %v234_v10 = vsel %vm68_vm0, %v229_v52, %v230_v63  ;;  %v827_v17 = vpop.permute.xlu1 %826  ;;  %v2755_v52 = vstv %s2675_s23  ;;  %s2782_s23 = sld [smem:[#allocation4 + $0x4]] }
 0x15d   :  { %v235_v26 = vsel %vm232_vm7, %v224_v6, %v234_v10  ;;  %v831_v60 = vrot.slane %v827_v17, 4  ;;  %v825_v7 = vpop.permute.xlu0 %824  ;;  %v843_v51 = vmax.f32 %v2530_v23, %v827_v17  ;;  %v2758_v10 = vstv %s2677_s24  ;;  %s2784_s24 = sld [smem:[#allocation4 + $0x5]] }
 0x15e   :  { %v2655_v22 = vadd.f32 %v235_v26, %v217_v47  ;;  %v830_v21 = vrot.slane %v825_v7, 4  ;;  %v2761_v17 = vstv %s2681_s25  ;;  %v2764_v26 = vstv %s2683_s26  ;;  %s2797_s25 = sld [smem:[#allocation2 + $0x300]]  ;;  %s2799_s26 = sld [smem:[#allocation2 + $0x301]] }
 0x160   :  { %v834_v59 = vsel %vm68_vm0, %v830_v21, %v831_v60  ;;  %v1442_v30 = vpop.permute.xlu1 %1441  ;;  %v2774_v60 = vstv %s2687_s27  ;;  %v2780_v21 = vstv %s2694_s30  ;;  %s2813_s27 = sld [smem:[#allocation2 + $0x302]]  ;;  %s2827_s30 = sld [smem:[#allocation2 + $0x381]] }
 0x161   :  { %v835_v33 = vsel %vm182_vm5, %v825_v7, %v834_v59  ;;  %v1446_v35 = vrot.slane %v1442_v30, 4  ;;  %v1440_v11 = vpop.permute.xlu0 %1439  ;;  %v1458_v48 = vmin.f32 %v2547_v8, %v1442_v30  ;;  %v2777_v7 = vstv %s2689_s28  ;;  %s2815_s28 = sld [smem:[#allocation2 + $0x303]] }
 0x162   :  { %v1445_v39 = vrot.slane %v1440_v11, 4  ;;  %v842_v28 = vmax.f32 %v2532_v18, %v835_v33  ;;  %v2789_v30 = vstv %s2697_s7  ;;  %v2792_v33 = vstv %s2699_s2  ;;  %s2838_s7 = sld [smem:[#allocation2 + $0x382]]  ;;  %s2840_s2 = sld [smem:[#allocation2 + $0x383]] }
 0x164   :  { %v1449_v29 = vsel %vm68_vm0, %v1445_v39, %v1446_v35  ;;  %v2660_v4 = vpop.permute.xlu1 %822  ;;  %v2795_v35 = vstv %s2706_s3  ;;  %v2802_v39 = vstv %s2708_s8  ;;  %s2854_s3 = sld [smem:[#allocation2 + $0x400]]  ;;  %s2856_s8 = sld [smem:[#allocation2 + $0x401]] }
 0x165   :  { %v1450_v40 = vsel %vm182_vm5, %v1440_v11, %v1449_v29  ;;  %v829_v41 = vrot.slane %v2660_v4, 4  ;;  %v821_v42 = vpop.permute.xlu0 %820  ;;  %v2805_v29 = vstv %s2710_s9  ;;  %s2869_s9 = sld [smem:[#allocation2 + $0x402]] }
 0x166   :  { %v828_v49 = vrot.slane %v821_v42, 4  ;;  %v1457_v47 = vmin.f32 %v2551_v55, %v1450_v40  ;;  %v2811_v40 = vstv %s2714_s11  ;;  %s2880_s11 = sld [smem:[#allocation4 + $0x6]] }
 0x168   :  { %v832_v9 = vsel %vm68_vm0, %v828_v49, %v829_v41  ;;  %v851_v27 = vpop.permute.xlu1 %850 }
 0x169   :  { %v2667_v19 = vsel %vm182_vm5, %v821_v42, %v832_v9  ;;  %v855_v13 = vrot.slane %v851_v27, 4  ;;  %v2669_v25 = vmax.f32 %v843_v51, %v851_v27  ;;  %v849_v16 = vpop.permute.xlu0 %848  ;;  %v2820_v51 = vstv %s2716_s12  ;;  %s2894_s12 = sld [smem:[#allocation4 + $0x7]] }
 0x16a   :  { %v854_v43 = vrot.slane %v849_v16, 4  ;;  %3584 = vst [vmem:[#allocation12_spill] sm:$0xff] %v2820_v51  ;;  %v2823_v9 = vstv %s2722_s13  ;;  %s2896_s13 = sld [smem:[#allocation4 + $0x8]] }
 0x16b   :  { %3585 = vst [vmem:[#allocation13_spill] sm:$0xff] %v2823_v9 }
 0x16c   :  { %v858_v15 = vsel %vm68_vm0, %v854_v43, %v855_v13  ;;  %v2673_v44 = vpop.permute.xlu1 %1437  ;;  %v2830_v13 = vstv %s2724_s14  ;;  %v2836_v43 = vstv %s2731_s16 }
 0x16d   :  { %v859_v23 = vsel %vm207_vm6, %v849_v16, %v858_v15  ;;  %v1444_v12 = vrot.slane %v2673_v44, 4  ;;  %v1436_v31 = vpop.permute.xlu0 %1435  ;;  %v1456_v59 = vmin.f32 %v2583_v36, %v2673_v44  ;;  %v2808_v36 = vstv %s2712_s10  ;;  %3586 = vst [vmem:[#allocation14_spill] sm:$0xff] %v2830_v13  ;;  %3588 = vst [vmem:[#allocation16_spill] sm:$0xff] %v2836_v43  ;;  %s2871_s10 = sld [smem:[#allocation2 + $0x403]] }
 0x16e   :  { %v2685_v45 = vmax.f32 %v842_v28, %v859_v23  ;;  %v1443_v18 = vrot.slane %v1436_v31, 4  ;;  %v2833_v16 = vstv %s2729_s15  ;;  %v2843_v28 = vstv %s2735_s0 }
 0x16f   :  { %3587 = vst [vmem:[#allocation15_spill] sm:$0xff] %v2833_v16  ;;  %3589 = vst [vmem:[#allocation17_spill] sm:$0xff] %v2843_v28  ;;  %v2846_v15 = vstv %s2737_s17  ;;  %v2849_v44 = vstv %s2739_s18  ;;  %v2852_v23 = vstv %s2741_s1 }
 0x170   :  { %3580 = vst [vmem:[#allocation8_spill] sm:$0xff] %v2685_v45  ;;  %v1447_v0 = vsel %vm68_vm0, %v1443_v18, %v1444_v12  ;;  %v1466_v24 = vpop.permute.xlu1 %1465  ;;  %3590 = vst [vmem:[#allocation18_spill] sm:$0xff] %v2846_v15 }
 0x171   :  { %v2702_v50 = vsel %vm182_vm5, %v1436_v31, %v1447_v0  ;;  %v1470_v46 = vrot.slane %v1466_v24, 4  ;;  %v2704_v53 = vmin.f32 %v1458_v48, %v1466_v24  ;;  %v1464_v8 = vpop.permute.xlu0 %1463  ;;  %3591 = vst [vmem:[#allocation19_spill] sm:$0xff] %v2849_v44  ;;  %3592 = vst [vmem:[#allocation20_spill] sm:$0xff] %v2852_v23  ;;  %v2864_v48 = vstv %s2748_s19 }
 0x172   :  { %v1469_v58 = vrot.slane %v1464_v8, 4  ;;  %v1455_v12 = vmin.f32 %v2585_v14, %v2702_v50  ;;  %3594 = vst [vmem:[#allocation22_spill] sm:$0xff] %v2864_v48  ;;  %v2878_v50 = vstv %s2768_s22  ;;  %v2912_v14 = vstv %s2813_s27 }
 0x173   :  { %3581 = vst [vmem:[#allocation9_spill] sm:$0xff] %v2704_v53  ;;  %3596 = vst [vmem:[#allocation24_spill] sm:$0xff] %v2878_v50  ;;  %v2928_v53 = vstv %s2838_s7 }
 0x174   :  { %v1473_v32 = vsel %vm68_vm0, %v1469_v58, %v1470_v46  ;;  %v2720_v57 = vpop.permute.xlu1 %846  ;;  %3604 = vst [vmem:[#allocation32_spill] sm:$0xff] %v2912_v14  ;;  %3608 = vst [vmem:[#allocation36_spill] sm:$0xff] %v2928_v53 }
 0x175   :  { %v1474_v62 = vsel %vm207_vm6, %v1464_v8, %v1473_v32  ;;  %v2727_v38 = vpop.permute.xlu0 %844  ;;  %v853_v46 = vrot.slane %v2720_v57, 4 }
 0x176   :  { %v2733_v55 = vmin.f32 %v1457_v47, %v1474_v62  ;;  %v852_v8 = vrot.slane %v2727_v38, 4  ;;  %v2889_v62 = vstv %s2766_s21 }
 0x177   :  { %3598 = vst [vmem:[#allocation26_spill] sm:$0xff] %v2889_v62 }
 0x178   :  { %3582 = vst [vmem:[#allocation10_spill] sm:$0xff] %v2733_v55  ;;  %v2746_v63 = vpop.permute.xlu1 %874 }
 0x179   :  { %v2752_v6 = vpop.permute.xlu0 %872  ;;  %v879_v47 = vrot.slane %v2746_v63, 4 }
 0x17a   :  { %v878_v32 = vrot.slane %v2752_v6, 4 }
 0x17c   :  { %v1462_v11 = vpop.permute.xlu1 %1461 }
 0x17d   :  { %v1468_v41 = vrot.slane %v1462_v11, 4  ;;  %v2817_v42 = vmin.f32 %v1456_v59, %v1462_v11  ;;  %v1460_v49 = vpop.permute.xlu0 %1459  ;;  %v2892_v59 = vstv %s2782_s23 }
 0x17e   :  { %v1467_v27 = vrot.slane %v1460_v49, 4  ;;  %3599 = vst [vmem:[#allocation27_spill] sm:$0xff] %v2892_v59 }
 0x17f   :  { %3583 = vst [vmem:[#allocation11_spill] sm:$0xff] %v2817_v42 }
 0x180   :  { %v1471_v31 = vsel %vm68_vm0, %v1467_v27, %v1468_v41  ;;  %v2861_v18 = vpop.permute.xlu1 %1489  ;;  %v2903_v27 = vstv %s2797_s25 }
 0x181   :  { %3593 = vst [vmem:[#allocation21_spill] sm:$0xff] %v2861_v18  ;;  %v1472_v54 = vsel %vm207_vm6, %v1460_v49, %v1471_v31  ;;  %v1494_v0 = vrot.slane %v2861_v18, 4  ;;  %v1488_v24 = vpop.permute.xlu0 %1487  ;;  %v2900_v49 = vstv %s2784_s24  ;;  %3601 = vst [vmem:[#allocation29_spill] sm:$0xff] %v2903_v27  ;;  %v2943_v27 = vstv %s2871_s10 }
 0x182   :  { %v2884_v58 = vmin.f32 %v1455_v12, %v1472_v54  ;;  %v1493_v56 = vrot.slane %v1488_v24, 4  ;;  %3600 = vst [vmem:[#allocation28_spill] sm:$0xff] %v2900_v49  ;;  %v2906_v12 = vstv %s2799_s26  ;;  %v2931_v49 = vstv %s2840_s2  ;;  %3613 = vst [vmem:[#allocation41_spill] sm:$0xff] %v2943_v27 }
 0x183   :  { %3602 = vst [vmem:[#allocation30_spill] sm:$0xff] %v2906_v12  ;;  %3609 = vst [vmem:[#allocation37_spill] sm:$0xff] %v2931_v49  ;;  %v2950_v49 = vstv %s2880_s11 }
 0x184   :  { %3597 = vst [vmem:[#allocation25_spill] sm:$0xff] %v2884_v58  ;;  %v1497_v11 = vsel %vm68_vm0, %v1493_v56, %v1494_v0  ;;  %v222_v41 = vpop.permute.xlu1 %221  ;;  %v2915_v0 = vstv %s2815_s28  ;;  %v2918_v56 = vstv %s2825_s29  ;;  %v856_v58 = vsel %vm68_vm0, %v852_v8, %v853_v46  ;;  %3614 = vst [vmem:[#allocation42_spill] sm:$0xff] %v2950_v49 }
 0x185   :  { %v2909_v31 = vsel %vm232_vm7, %v1488_v24, %v1497_v11  ;;  %v220_v54 = vpop.permute.xlu0 %219  ;;  %3605 = vst [vmem:[#allocation33_spill] sm:$0xff] %v2915_v0  ;;  %3606 = vst [vmem:[#allocation34_spill] sm:$0xff] %v2918_v56  ;;  %v228_v12 = vrot.slane %v222_v41, 4  ;;  %v882_v24 = vsel %vm68_vm0, %v878_v32, %v879_v47  ;;  %v2925_v11 = vstv %s2827_s30 }
 0x186   :  { %3603 = vst [vmem:[#allocation31_spill] sm:$0xff] %v2909_v31  ;;  %v227_v18 = vrot.slane %v220_v54, 4  ;;  %3607 = vst [vmem:[#allocation35_spill] sm:$0xff] %v2925_v11  ;;  %v2934_v0 = vstv %s2854_s3  ;;  %v2937_v46 = vstv %s2856_s8  ;;  %v2940_v8 = vstv %s2869_s9 }
 0x187   :  { %3610 = vst [vmem:[#allocation38_spill] sm:$0xff] %v2934_v0  ;;  %3611 = vst [vmem:[#allocation39_spill] sm:$0xff] %v2937_v46  ;;  %v841_v47 = vmax.f32 %v2561_v34, %v2660_v4  ;;  %v857_v32 = vsel %vm207_vm6, %v2727_v38, %v856_v58  ;;  %v840_v0 = vmax.f32 %v2564_v37, %v2667_v19  ;;  %v2964_v4 = vstv %s2894_s12 }
 0x188   :  { %v251_v14 = vpop.permute.xlu1 %250  ;;  %3612 = vst [vmem:[#allocation40_spill] sm:$0xff] %v2940_v8  ;;  %v2956_v46 = vsel %vm232_vm7, %v2752_v6, %v882_v24  ;;  %v231_v8 = vsel %vm68_vm0, %v227_v18, %v228_v12  ;;  %3616 = vst [vmem:[#allocation44_spill] sm:$0xff] %v2964_v4  ;;  %v2967_v38 = vstv %s2896_s13 }
 0x189   :  { %v255_v31 = vrot.slane %v251_v14, 4  ;;  %v249_v55 = vpop.permute.xlu0 %248  ;;  %3615 = vst [vmem:[#allocation43_spill] sm:$0xff] %v2956_v46  ;;  %v2960_v53 = vmax.f32 %v841_v47, %v2720_v57  ;;  %3617 = vst [vmem:[#allocation45_spill] sm:$0xff] %v2967_v38  ;;  %v2969_v58 = vmax.f32 %v840_v0, %v857_v32  ;;  %v2983_v12 = vsel %vm232_vm7, %v220_v54, %v231_v8 }
 0x18a   :  { %v254_v27 = vrot.slane %v249_v55, 4 }
 0x18b   :  { %v262_v34 = vsel %vm257_vm8, %v251_v14, %v255_v31  ;;  %3618 = vst [vmem:[#allocation46_spill] sm:$0xff] %v2969_v58  ;;  %v2980_v14 = vadd.f32 %v222_v41, %v2644_v20 }
 0x18c   :  { %v270_v19 = vadd.f32 %v262_v34, %v2649_v61  ;;  %v260_v6 = vsel %vm68_vm0, %v254_v27, %v255_v31  ;;  %v2975_v18 = vpop.permute.xlu1 %870 }
 0x18d   :  { %3619 = vst [vmem:[#allocation47_spill] sm:$0xff] %v2980_v14  ;;  %v261_v0 = vsel %vm257_vm8, %v249_v55, %v260_v6  ;;  %v877_v27 = vrot.slane %v2975_v18, 4  ;;  %v869_v6 = vpop.permute.xlu0 %868 }
 0x18e   :  { %v282_v24 = vmul.f32 %v2758_v10, %v270_v19  ;;  %v308_v47 = vmul.f32 %v2761_v17, %v270_v19  ;;  %v334_v61 = vmul.f32 %v2764_v26, %v270_v19  ;;  %v276_v31 = vmul.f32 %v2755_v52, %v270_v19 }
 0x18f   :  { %v426_v32 = vmul.f32 %v2777_v7, %v270_v19  ;;  %v452_v20 = vmul.f32 %v2780_v21, %v270_v19  ;;  %v478_v41 = vmul.f32 %v2789_v30, %v270_v19  ;;  %v420_v55 = vmul.f32 %v2774_v60, %v270_v19 }
 0x190   :  { %v1952_v54 = vrot.slane %v282_v24, 9  ;;  %v1957_v8 = vrot.slane %v308_v47, 10  ;;  %v1962_v34 = vrot.slane %v334_v61, 11  ;;  %v554_v38 = vmul.f32 %v2795_v35, %v270_v19  ;;  %v2997_v49 = vpop.permute.xlu1 %898 }
 0x191   :  { %v1968_v57 = vrot.slane %v426_v32, 9  ;;  %v1973_v37 = vrot.slane %v452_v20, 10  ;;  %v560_v4 = vmul.f32 %v2802_v39, %v270_v19  ;;  %v586_v56 = vmul.f32 %v2805_v29, %v270_v19 }
 0x192   :  { %v302_v14 = vadd.f32 %v1952_v54, %v276_v31  ;;  %v612_v11 = vmul.f32 %v2808_v36, %v270_v19  ;;  %v269_v24 = vadd.f32 %v261_v0, %v2655_v22  ;;  %v1978_v61 = vrot.slane %v478_v41, 11 }
 0x193   :  { %v446_v47 = vadd.f32 %v1968_v57, %v420_v55  ;;  %v1986_v42 = vrot.slane %v560_v4, 9  ;;  %v876_v59 = vrot.slane %v869_v6, 4  ;;  %v1991_v32 = vrot.slane %v586_v56, 10 }
 0x194   :  { %v328_v62 = vadd.f32 %v1957_v8, %v302_v14  ;;  %v1996_v20 = vrot.slane %v612_v11, 11  ;;  %v903_v46 = vrot.slane %v2997_v49, 4  ;;  %v281_v2 = vmul.f32 %v2758_v10, %v269_v24 }
 0x195   :  { %v472_v45 = vadd.f32 %v1973_v37, %v446_v47  ;;  %v580_v50 = vadd.f32 %v1986_v42, %v554_v38  ;;  %v307_v31 = vmul.f32 %v2761_v17, %v269_v24  ;;  %v275_v19 = vmul.f32 %v2755_v52, %v269_v24 }
 0x196   :  { %v354_v54 = vadd.f32 %v1962_v34, %v328_v62  ;;  %v333_v22 = vmul.f32 %v2764_v26, %v269_v24  ;;  %v425_v57 = vmul.f32 %v2777_v7, %v269_v24  ;;  %v1951_v14 = vrot.slane %v281_v2, 9 }
 0x197   :  { %v498_v4 = vadd.f32 %v1978_v61, %v472_v45  ;;  %v606_v0 = vadd.f32 %v1991_v32, %v580_v50  ;;  %v419_v56 = vmul.f32 %v2774_v60, %v269_v24  ;;  %v1956_v37 = vrot.slane %v307_v31, 10 }
 0x198   :  { %v360_v11 = vadd.f32 %v2771_v5, %v354_v54  ;;  %v1967_v42 = vrot.slane %v425_v57, 9  ;;  %v451_v38 = vmul.f32 %v2780_v21, %v269_v24  ;;  %v301_v8 = vadd.f32 %v1951_v14, %v275_v19 }
 0x199   :  { %v504_v41 = vadd.f32 %v2792_v33, %v498_v4  ;;  %v632_v62 = vadd.f32 %v1996_v20, %v606_v0  ;;  %v477_v34 = vmul.f32 %v2789_v30, %v269_v24  ;;  %v1961_v47 = vrot.slane %v333_v22, 11 }
 0x19a   :  { %v393_v55 = vrot.slane %v360_v11, %v2744_v3  ;;  %v445_v45 = vadd.f32 %v1967_v42, %v419_v56  ;;  %v1972_v50 = vrot.slane %v451_v38, 10  ;;  %v327_v32 = vadd.f32 %v1956_v37, %v301_v8  ;;  %v897_v38 = vpop.permute.xlu0 %896 }
 0x19b   :  { %v537_v2 = vrot.slane %v504_v41, %v2744_v3  ;;  %v3016_v61 = vadd.f32 %v2811_v40, %v632_v62  ;;  %v1977_v31 = vrot.slane %v477_v34, 11  ;;  %v559_v57 = vmul.f32 %v2802_v39, %v269_v24 }
 0x19c   :  { %v471_v54 = vadd.f32 %v1972_v50, %v445_v45  ;;  %v585_v20 = vmul.f32 %v2805_v29, %v269_v24  ;;  %v611_v19 = vmul.f32 %v2808_v36, %v269_v24  ;;  %v353_v22 = vadd.f32 %v1961_v47, %v327_v32 }
 0x19d   :  { %v671_v4 = vrot.slane %v3016_v61, %v2744_v3  ;;  %v880_v0 = vsel %vm68_vm0, %v876_v59, %v877_v27  ;;  %v909_v14 = vsel %vm257_vm8, %v2997_v49, %v903_v46  ;;  %v3030_v56 = vadd.f32 %v2983_v12, %v2651_v1 }
 0x19e   :  { %v497_v11 = vadd.f32 %v1977_v31, %v471_v54  ;;  %v553_v37 = vmul.f32 %v2795_v35, %v269_v24  ;;  %v1985_v42 = vrot.slane %v559_v57, 9  ;;  %v359_v41 = vadd.f32 %v2771_v5, %v353_v22 }
 0x19f   :  { %v3037_v59 = vsel %vm232_vm7, %v869_v6, %v880_v0  ;;  %v3621_v27 = vmax.f32 %v2669_v25, %v2746_v63  ;;  %v1990_v34 = vrot.slane %v585_v20, 10  ;;  %v1995_v47 = vrot.slane %v611_v19, 11 }
 0x1a0   :  { %3620 = vst [vmem:[#allocation48_spill] sm:$0xff] %v3037_v59  ;;  %v503_v1 = vadd.f32 %v2792_v33, %v497_v11  ;;  %v579_v12 = vadd.f32 %v1985_v42, %v553_v37  ;;  %v386_v24 = vrot.slane %v359_v41, %v2744_v3  ;;  %v902_v61 = vrot.slane %v897_v38, 4  ;;  %v3629_v59 = vld [vmem:[#allocation26_spill] sm:$0xff] }
 0x1a1   :  { %v917_v8 = vmax.f32 %v3621_v27, %v909_v14 }
 0x1a2   :  { %v530_v32 = vrot.slane %v503_v1, %v2744_v3  ;;  %v605_v6 = vadd.f32 %v1990_v34, %v579_v12  ;;  %v394_v63 = vcombine.low %v386_v24, %v393_v55 }
 0x1a3   :  { %v929_v45 = vmul.f32 %v2823_v9, %v917_v8  ;;  %v955_v50 = vmul.f32 %v2830_v13, %v917_v8  ;;  %v981_v25 = vmul.f32 %v2833_v16, %v917_v8  ;;  %v923_v54 = vmul.f32 %v2820_v51, %v917_v8 }
 0x1a4   :  { %v1062_v20 = vmul.f32 %v2843_v28, %v917_v8  ;;  %v538_v19 = vcombine.low %v530_v32, %v537_v2  ;;  %v631_v22 = vadd.f32 %v1995_v47, %v605_v6  ;;  %v1056_v0 = vmul.f32 %v2836_v43, %v917_v8  ;;  %v3058_v47 = vpop.permute.xlu1 %1485  ;;  %v3623_v6 = vld [vmem:[#allocation23_spill] sm:$0xff] }
 0x1a5   :  { %v2004_v57 = vrot.slane %v929_v45, 9  ;;  %v1088_v14 = vmul.f32 %v2846_v15, %v917_v8  ;;  %v2009_v37 = vrot.slane %v955_v50, 10  ;;  %v1114_v41 = vmul.f32 %v2849_v44, %v917_v8  ;;  %3622 = vst [vmem:[#allocation49_spill] sm:$0xff] %v3058_v47 }
 0x1a6   :  { %v2021_v42 = vrot.slane %v1062_v20, 9  ;;  %v637_v27 = vadd.f32 %v2811_v40, %v631_v22  ;;  %v2014_v1 = vrot.slane %v981_v25, 11  ;;  %v1190_v12 = vmul.f32 %v2852_v23, %v917_v8 }
 0x1a7   :  { %v949_v11 = vadd.f32 %v2004_v57, %v923_v54  ;;  %v2026_v55 = vrot.slane %v1088_v14, 10  ;;  %v2031_v45 = vrot.slane %v1114_v41, 11  ;;  %v1196_v2 = vmul.f32 %v2864_v48, %v917_v8  ;;  %v3624_v54 = vld [vmem:[#allocation24_spill] sm:$0xff]  ;;  %v3627_v41 = vld [vmem:[#allocation43_spill] sm:$0xff] }
 0x1a8   :  { %v1082_v24 = vadd.f32 %v2021_v42, %v1056_v0  ;;  %v664_v32 = vrot.slane %v637_v27, %v2744_v3  ;;  %v1222_v50 = vmul.f32 %v3623_v6, %v917_v8  ;;  %v1248_v57 = vmul.f32 %v3624_v54, %v917_v8  ;;  %v3626_v42 = vld [vmem:[#allocation8_spill] sm:$0xff] }
 0x1a9   :  { %v975_v34 = vadd.f32 %v2009_v37, %v949_v11  ;;  %v907_v25 = vsel %vm68_vm0, %v902_v61, %v903_v46  ;;  %v2039_v14 = vrot.slane %v1196_v2, 9  ;;  %v3067_v11 = vrot.slane %v394_v63, 7 }
 0x1aa   :  { %v1108_v22 = vadd.f32 %v2026_v55, %v1082_v24  ;;  %v908_v0 = vsel %vm257_vm8, %v897_v38, %v907_v25  ;;  %v672_v37 = vcombine.low %v664_v32, %v671_v4  ;;  %v3628_v31 = vmax.f32 %v3626_v42, %v3627_v41  ;;  %v1484_v4 = vpop.permute.xlu0 %1483 }
 0x1ab   :  { %v1001_v20 = vadd.f32 %v2014_v1, %v975_v34  ;;  %3625 = vst [vmem:[#allocation50_spill] sm:$0xff] %v3067_v11  ;;  %v1492_v62 = vrot.slane %v3058_v47, 4  ;;  %v1216_v58 = vadd.f32 %v2039_v14, %v1190_v12  ;;  %v2044_v46 = vrot.slane %v1222_v50, 10  ;;  %v1514_v14 = vpop.permute.xlu1 %1513 }
 0x1ac   :  { %v916_v27 = vmax.f32 %v3628_v31, %v908_v0  ;;  %v1134_v49 = vadd.f32 %v2031_v45, %v1108_v22  ;;  %v3076_v61 = vrot.slane %v538_v19, 7  ;;  %v2049_v1 = vrot.slane %v1248_v57, 11  ;;  %v3631_v31 = vld [vmem:[#allocation27_spill] sm:$0xff] }
 0x1ad   :  { %v3074_v8 = vadd.f32 %v3629_v59, %v1001_v20  ;;  %v1242_v24 = vadd.f32 %v2044_v46, %v1216_v58  ;;  %v1491_v32 = vrot.slane %v1484_v4, 4 }
 0x1ae   :  { %3630 = vst [vmem:[#allocation8_spill] sm:$0xff] %v3076_v61  ;;  %v928_v38 = vmul.f32 %v2823_v9, %v916_v27  ;;  %v954_v63 = vmul.f32 %v2830_v13, %v916_v27  ;;  %v3083_v34 = vadd.f32 %v3631_v31, %v1134_v49  ;;  %v980_v2 = vmul.f32 %v2833_v16, %v916_v27 }
 0x1af   :  { %v1040_v55 = vrot.slane %v3074_v8, %v2744_v3  ;;  %v922_v12 = vmul.f32 %v2820_v51, %v916_v27  ;;  %v1061_v19 = vmul.f32 %v2843_v28, %v916_v27  ;;  %v1268_v25 = vadd.f32 %v2049_v1, %v1242_v24  ;;  %v3633_v8 = vld [vmem:[#allocation28_spill] sm:$0xff]  ;;  %v1512_v24 = vpop.permute.xlu0 %1511 }
 0x1b0   :  { %v2003_v45 = vrot.slane %v928_v38, 9  ;;  %v1173_v57 = vrot.slane %v3083_v34, %v2744_v3  ;;  %v2008_v20 = vrot.slane %v954_v63, 10  ;;  %v1087_v22 = vmul.f32 %v2846_v15, %v916_v27 }
 0x1b1   :  { %v1055_v58 = vmul.f32 %v2836_v43, %v916_v27  ;;  %v2020_v42 = vrot.slane %v1061_v19, 9  ;;  %v1113_v41 = vmul.f32 %v2849_v44, %v916_v27  ;;  %v1274_v49 = vadd.f32 %v3633_v8, %v1268_v25 }
 0x1b2   :  { %v948_v0 = vadd.f32 %v2003_v45, %v922_v12  ;;  %v2013_v46 = vrot.slane %v980_v2, 11  ;;  %v1195_v38 = vmul.f32 %v2864_v48, %v916_v27  ;;  %v1221_v50 = vmul.f32 %v3623_v6, %v916_v27 }
 0x1b3   :  { %v1081_v34 = vadd.f32 %v2020_v42, %v1055_v58  ;;  %v2025_v1 = vrot.slane %v1087_v22, 10  ;;  %v1189_v63 = vmul.f32 %v2852_v23, %v916_v27  ;;  %v1307_v12 = vrot.slane %v1274_v49, %v2744_v3 }
 0x1b4   :  { %v974_v47 = vadd.f32 %v2008_v20, %v948_v0  ;;  %v2038_v45 = vrot.slane %v1195_v38, 9  ;;  %v1247_v19 = vmul.f32 %v3624_v54, %v916_v27  ;;  %v2030_v25 = vrot.slane %v1113_v41, 11  ;;  %v3102_v0 = vpop.permute.xlu1 %246  ;;  %v3636_v41 = vld [vmem:[#allocation21_spill] sm:$0xff] }
 0x1b5   :  { %v1107_v11 = vadd.f32 %v2025_v1, %v1081_v34  ;;  %v1518_v2 = vrot.slane %v1514_v14, 4  ;;  %v2043_v48 = vrot.slane %v1221_v50, 10  ;;  %v1495_v6 = vsel %vm68_vm0, %v1491_v32, %v1492_v62  ;;  %v3641_v1 = vld [vmem:[#allocation32_spill] sm:$0xff] }
 0x1b6   :  { %v1000_v61 = vadd.f32 %v2013_v46, %v974_v47  ;;  %v1215_v44 = vadd.f32 %v2038_v45, %v1189_v63  ;;  %v1517_v20 = vrot.slane %v1512_v24, 4  ;;  %v3106_v42 = vsel %vm232_vm7, %v1484_v4, %v1495_v6  ;;  %v3635_v46 = vld [vmem:[#allocation9_spill] sm:$0xff] }
 0x1b7   :  { %v1133_v58 = vadd.f32 %v2030_v25, %v1107_v11  ;;  %3634 = vst [vmem:[#allocation43_spill] sm:$0xff] %v3106_v42  ;;  %v1524_v27 = vsel %vm257_vm8, %v1514_v14, %v1518_v2  ;;  %v2048_v47 = vrot.slane %v1247_v19, 11  ;;  %v3637_v38 = vmin.f32 %v3635_v46, %v3636_v41  ;;  %v3642_v25 = vld [vmem:[#allocation33_spill] sm:$0xff]  ;;  %v3646_v11 = vld [vmem:[#allocation36_spill] sm:$0xff] }
 0x1b8   :  { %v1006_v22 = vadd.f32 %v3629_v59, %v1000_v61  ;;  %v1241_v49 = vadd.f32 %v2043_v48, %v1215_v44  ;;  %v1522_v50 = vsel %vm68_vm0, %v1517_v20, %v1518_v2  ;;  %v3113_v62 = vrot.slane %v672_v37, 7  ;;  %v3640_v44 = vld [vmem:[#allocation30_spill] sm:$0xff]  ;;  %v3647_v4 = vld [vmem:[#allocation37_spill] sm:$0xff] }
 0x1b9   :  { %v1532_v34 = vmin.f32 %v3637_v38, %v1524_v27  ;;  %v1139_v61 = vadd.f32 %v3631_v31, %v1133_v58  ;;  %v1523_v2 = vsel %vm257_vm8, %v1512_v24, %v1522_v50  ;;  %v3645_v38 = vld [vmem:[#allocation34_spill] sm:$0xff] }
 0x1ba   :  { %3638 = vst [vmem:[#allocation9_spill] sm:$0xff] %v3113_v62  ;;  %v1033_v32 = vrot.slane %v1006_v22, %v2744_v3  ;;  %v1267_v6 = vadd.f32 %v2048_v47, %v1241_v49  ;;  %v3643_v22 = vld [vmem:[#allocation29_spill] sm:$0xff]  ;;  %v3644_v49 = vld [vmem:[#allocation35_spill] sm:$0xff]  ;;  %v3650_v59 = vld [vmem:[#allocation38_spill] sm:$0xff] }
 0x1bb   :  { %v1544_v48 = vmul.f32 %v3640_v44, %v1532_v34  ;;  %v1570_v63 = vmul.f32 %v3641_v1, %v1532_v34  ;;  %v1166_v19 = vrot.slane %v1139_v61, %v2744_v3  ;;  %v1596_v37 = vmul.f32 %v3642_v25, %v1532_v34 }
 0x1bc   :  { %v1041_v45 = vcombine.low %v1033_v32, %v1040_v55  ;;  %v1273_v20 = vadd.f32 %v3633_v8, %v1267_v6  ;;  %v1538_v58 = vmul.f32 %v3643_v22, %v1532_v34  ;;  %v1677_v47 = vmul.f32 %v3644_v49, %v1532_v34  ;;  %v3648_v8 = vld [vmem:[#allocation39_spill] sm:$0xff] }
 0x1bd   :  { %v2057_v27 = vrot.slane %v1544_v48, 9  ;;  %v3128_v46 = vcombine.low %v1166_v19, %v1173_v57  ;;  %v2062_v41 = vrot.slane %v1570_v63, 10  ;;  %v1671_v14 = vmul.f32 %v3645_v38, %v1532_v34 }
 0x1be   :  { %v1703_v55 = vmul.f32 %v3646_v11, %v1532_v34  ;;  %v1300_v32 = vrot.slane %v1273_v20, %v2744_v3  ;;  %v2074_v42 = vrot.slane %v1677_v47, 9  ;;  %v1729_v24 = vmul.f32 %v3647_v4, %v1532_v34  ;;  %v3652_v47 = vld [vmem:[#allocation41_spill] sm:$0xff] }
 0x1bf   :  { %v1564_v61 = vadd.f32 %v2057_v27, %v1538_v58  ;;  %v2067_v50 = vrot.slane %v1596_v37, 11  ;;  %v1811_v62 = vmul.f32 %v3648_v8, %v1532_v34  ;;  %v3649_v48 = vrot.slane %v3102_v0, 4  ;;  %v3651_v58 = vld [vmem:[#allocation40_spill] sm:$0xff]  ;;  %v3653_v37 = vld [vmem:[#allocation10_spill] sm:$0xff] }
 0x1c0   :  { %v2079_v6 = vrot.slane %v1703_v55, 10  ;;  %v3139_v63 = vcombine.low %v1300_v32, %v1307_v12  ;;  %v1697_v31 = vadd.f32 %v2074_v42, %v1671_v14  ;;  %v1805_v54 = vmul.f32 %v3650_v59, %v1532_v34  ;;  %v3654_v55 = vld [vmem:[#allocation31_spill] sm:$0xff] }
 0x1c1   :  { %v259_v57 = vsel %vm257_vm8, %v3102_v0, %v3649_v48  ;;  %v1590_v19 = vadd.f32 %v2062_v41, %v1564_v61  ;;  %v2092_v20 = vrot.slane %v1811_v62, 9  ;;  %v1837_v27 = vmul.f32 %v3651_v58, %v1532_v34  ;;  %v3656_v42 = vld [vmem:[#allocation47_spill] sm:$0xff]  ;;  %v3657_v62 = vld [vmem:[#allocation42_spill] sm:$0xff] }
 0x1c2   :  { %v1863_v23 = vmul.f32 %v3652_v47, %v1532_v34  ;;  %v3655_v15 = vmin.f32 %v3653_v37, %v3654_v55  ;;  %v3147_v43 = vrot.slane %v1041_v45, 7  ;;  %v1723_v13 = vadd.f32 %v2079_v6, %v1697_v31 }
 0x1c3   :  { %v1616_v16 = vadd.f32 %v2067_v50, %v1590_v19  ;;  %v2084_v48 = vrot.slane %v1729_v24, 11  ;;  %v1831_v12 = vadd.f32 %v2092_v20, %v1805_v54  ;;  %v2097_v32 = vrot.slane %v1837_v27, 10 }
 0x1c4   :  { %v1531_v28 = vmin.f32 %v3655_v15, %v1523_v2  ;;  %v2102_v41 = vrot.slane %v1863_v23, 11  ;;  %v3150_v14 = vadd.f32 %v259_v57, %v3656_v42  ;;  %v3658_v23 = vld [vmem:[#allocation44_spill] sm:$0xff] }
 0x1c5   :  { %v1622_v61 = vadd.f32 %v3657_v62, %v1616_v16  ;;  %v1749_v9 = vadd.f32 %v2084_v48, %v1723_v13  ;;  %v1857_v37 = vadd.f32 %v2097_v32, %v1831_v12  ;;  %v3659_v48 = vld [vmem:[#allocation45_spill] sm:$0xff] }
 0x1c6   :  { %v1543_v34 = vmul.f32 %v3640_v44, %v1531_v28  ;;  %v1569_v51 = vmul.f32 %v3641_v1, %v1531_v28  ;;  %v1537_v15 = vmul.f32 %v3643_v22, %v1531_v28  ;;  %v1595_v45 = vmul.f32 %v3642_v25, %v1531_v28 }
 0x1c7   :  { %v1676_v31 = vmul.f32 %v3644_v49, %v1531_v28  ;;  %v1655_v54 = vrot.slane %v1622_v61, %v2744_v3  ;;  %v1755_v2 = vadd.f32 %v3658_v23, %v1749_v9  ;;  %v1670_v50 = vmul.f32 %v3645_v38, %v1531_v28 }
 0x1c8   :  { %v2056_v24 = vrot.slane %v1543_v34, 9  ;;  %v1883_v16 = vadd.f32 %v2102_v41, %v1857_v37  ;;  %v2061_v13 = vrot.slane %v1569_v51, 10  ;;  %v1702_v57 = vmul.f32 %v3646_v11, %v1531_v28 }
 0x1c9   :  { %v2073_v6 = vrot.slane %v1676_v31, 9  ;;  %v1788_v19 = vrot.slane %v1755_v2, %v2744_v3  ;;  %v2066_v27 = vrot.slane %v1595_v45, 11  ;;  %v1728_v55 = vmul.f32 %v3647_v4, %v1531_v28 }
 0x1ca   :  { %v1563_v20 = vadd.f32 %v2056_v24, %v1537_v15  ;;  %v1889_v12 = vadd.f32 %v3659_v48, %v1883_v16  ;;  %v2078_v42 = vrot.slane %v1702_v57, 10  ;;  %v1810_v9 = vmul.f32 %v3648_v8, %v1531_v28 }
 0x1cb   :  { %v1696_v32 = vadd.f32 %v2073_v6, %v1670_v50  ;;  %v1804_v34 = vmul.f32 %v3650_v59, %v1531_v28  ;;  %v1836_v51 = vmul.f32 %v3651_v58, %v1531_v28  ;;  %v1862_v41 = vmul.f32 %v3652_v47, %v1531_v28 }
 0x1cc   :  { %v1589_v61 = vadd.f32 %v2061_v13, %v1563_v20  ;;  %v1922_v37 = vrot.slane %v1889_v12, %v2744_v3  ;;  %v2083_v15 = vrot.slane %v1728_v55, 11  ;;  %v2091_v45 = vrot.slane %v1810_v9, 9  ;;  %v245_v13 = vpop.permute.xlu0 %244 }
 0x1cd   :  { %v1722_v31 = vadd.f32 %v2078_v42, %v1696_v32  ;;  %v2096_v24 = vrot.slane %v1836_v51, 10  ;;  %v274_v50 = vmul.f32 %v2755_v52, %v3150_v14  ;;  %v280_v16 = vmul.f32 %v2758_v10, %v3150_v14 }
 0x1ce   :  { %v1615_v2 = vadd.f32 %v2066_v27, %v1589_v61  ;;  %v1830_v57 = vadd.f32 %v2091_v45, %v1804_v34  ;;  %v306_v20 = vmul.f32 %v2761_v17, %v3150_v14  ;;  %v332_v28 = vmul.f32 %v2764_v26, %v3150_v14 }
 0x1cf   :  { %v1748_v6 = vadd.f32 %v2083_v15, %v1722_v31  ;;  %v2101_v12 = vrot.slane %v1862_v41, 11  ;;  %v1950_v27 = vrot.slane %v280_v16, 9  ;;  %v424_v32 = vmul.f32 %v2777_v7, %v3150_v14 }
 0x1d0   :  { %v1621_v55 = vadd.f32 %v3657_v62, %v1615_v2  ;;  %v1856_v9 = vadd.f32 %v2096_v24, %v1830_v57  ;;  %v1955_v61 = vrot.slane %v306_v20, 10  ;;  %v418_v34 = vmul.f32 %v2774_v60, %v3150_v14  ;;  %v893_v62 = vpop.permute.xlu0 %892 }
 0x1d1   :  { %v1754_v42 = vadd.f32 %v3658_v23, %v1748_v6  ;;  %v300_v31 = vadd.f32 %v1950_v27, %v274_v50  ;;  %v1966_v15 = vrot.slane %v424_v32, 9  ;;  %v450_v45 = vmul.f32 %v2780_v21, %v3150_v14  ;;  %v895_v23 = vpop.permute.xlu1 %894 }
 0x1d2   :  { %v1648_v51 = vrot.slane %v1621_v55, %v2744_v3  ;;  %v1882_v2 = vadd.f32 %v2101_v12, %v1856_v9  ;;  %v1960_v16 = vrot.slane %v332_v28, 11  ;;  %v476_v47 = vmul.f32 %v2789_v30, %v3150_v14 }
 0x1d3   :  { %v1781_v41 = vrot.slane %v1754_v42, %v2744_v3  ;;  %v326_v24 = vadd.f32 %v1955_v61, %v300_v31  ;;  %v444_v57 = vadd.f32 %v1966_v15, %v418_v34  ;;  %v1971_v20 = vrot.slane %v450_v45, 10 }
 0x1d4   :  { %v3190_v6 = vcombine.low %v1648_v51, %v1655_v54  ;;  %v3193_v50 = vrot.slane %v3128_v46, 7  ;;  %v1888_v27 = vadd.f32 %v3659_v48, %v1882_v2  ;;  %v558_v28 = vmul.f32 %v2802_v39, %v3150_v14 }
 0x1d5   :  { %v3195_v55 = vcombine.low %v1781_v41, %v1788_v19  ;;  %v352_v12 = vadd.f32 %v1960_v16, %v326_v24  ;;  %v470_v32 = vadd.f32 %v1971_v20, %v444_v57  ;;  %v1976_v42 = vrot.slane %v476_v47, 11  ;;  %v3223_v20 = vpop.permute.xlu1 %1509 }
 0x1d6   :  { %v584_v54 = vmul.f32 %v2805_v29, %v3150_v14  ;;  %v1915_v9 = vrot.slane %v1888_v27, %v2744_v3  ;;  %v552_v61 = vmul.f32 %v2795_v35, %v3150_v14  ;;  %v1984_v46 = vrot.slane %v558_v28, 9  ;;  %v3225_v27 = vpop.permute.xlu0 %1507 }
 0x1d7   :  { %v610_v19 = vmul.f32 %v2808_v36, %v3150_v14  ;;  %v3208_v34 = vrot.slane %v3139_v63, 7  ;;  %v3211_v51 = vadd.f32 %v2771_v5, %v352_v12  ;;  %v496_v31 = vadd.f32 %v1976_v42, %v470_v32 }
 0x1d8   :  { %v252_v47 = vrot.slane %v245_v13, 4  ;;  %v3213_v15 = vcombine.low %v1915_v9, %v1922_v37  ;;  %v578_v45 = vadd.f32 %v1984_v46, %v552_v61  ;;  %v1989_v41 = vrot.slane %v584_v54, 10 }
 0x1d9   :  { %v901_v2 = vrot.slane %v895_v23, 4  ;;  %v378_v16 = vrot.slane %v3211_v51, %v2744_v3  ;;  %v3218_v24 = vadd.f32 %v2792_v33, %v496_v31  ;;  %v3660_v14 = vrot.slane %v3102_v0, 4 }
 0x1da   :  { %v900_v57 = vrot.slane %v893_v62, 4  ;;  %v604_v37 = vadd.f32 %v1989_v41, %v578_v45  ;;  %v1994_v28 = vrot.slane %v610_v19, 11  ;;  %v3661_v0 = vmax.f32 %v2960_v53, %v2975_v18 }
 0x1db   :  { %v256_v63 = vsel %vm68_vm0, %v252_v47, %v3660_v14  ;;  %v906_v32 = vsel %vm257_vm8, %v895_v23, %v901_v2  ;;  %v522_v42 = vrot.slane %v3218_v24, %v2744_v3  ;;  %v3669_v23 = vld [vmem:[#allocation19_spill] sm:$0xff] }
 0x1dc   :  { %v258_v12 = vsel %vm257_vm8, %v245_v13, %v256_v63  ;;  %v3235_v9 = vmax.f32 %v3661_v0, %v906_v32  ;;  %v904_v61 = vsel %vm68_vm0, %v900_v57, %v901_v2  ;;  %v630_v46 = vadd.f32 %v1994_v28, %v604_v37  ;;  %v3663_v0 = vld [vmem:[#allocation13_spill] sm:$0xff] }
 0x1dd   :  { %v267_v54 = vadd.f32 %v258_v12, %v3030_v56  ;;  %v3239_v31 = vsel %vm257_vm8, %v893_v62, %v904_v61 }
 0x1de   :  { %v3248_v18 = vadd.f32 %v2811_v40, %v630_v46  ;;  %v927_v61 = vmul.f32 %v3663_v0, %v3235_v9 }
 0x1df   :  { %v273_v19 = vmul.f32 %v2755_v52, %v267_v54  ;;  %v279_v47 = vmul.f32 %v2758_v10, %v267_v54  ;;  %v305_v56 = vmul.f32 %v2761_v17, %v267_v54  ;;  %v331_v53 = vmul.f32 %v2764_v26, %v267_v54 }
 0x1e0   :  { %v417_v45 = vmul.f32 %v2774_v60, %v267_v54  ;;  %v423_v62 = vmul.f32 %v2777_v7, %v267_v54  ;;  %v449_v41 = vmul.f32 %v2780_v21, %v267_v54  ;;  %v475_v52 = vmul.f32 %v2789_v30, %v267_v54  ;;  %v3662_v30 = vld [vmem:[#allocation12_spill] sm:$0xff] }
 0x1e1   :  { %v1949_v2 = vrot.slane %v279_v47, 9  ;;  %v1954_v14 = vrot.slane %v305_v56, 10  ;;  %v1959_v63 = vrot.slane %v331_v53, 11  ;;  %v656_v10 = vrot.slane %v3248_v18, %v2744_v3  ;;  %v3664_v47 = vld [vmem:[#allocation14_spill] sm:$0xff] }
 0x1e2   :  { %v1965_v17 = vrot.slane %v423_v62, 9  ;;  %v1970_v26 = vrot.slane %v449_v41, 10  ;;  %v551_v57 = vmul.f32 %v2795_v35, %v267_v54  ;;  %v1975_v60 = vrot.slane %v475_v52, 11 }
 0x1e3   :  { %v299_v37 = vadd.f32 %v1949_v2, %v273_v19  ;;  %v557_v7 = vmul.f32 %v2802_v39, %v267_v54  ;;  %v583_v21 = vmul.f32 %v2805_v29, %v267_v54  ;;  %v609_v12 = vmul.f32 %v2808_v36, %v267_v54  ;;  %v3665_v36 = vld [vmem:[#allocation15_spill] sm:$0xff]  ;;  %v3666_v2 = vld [vmem:[#allocation16_spill] sm:$0xff] }
 0x1e4   :  { %v443_v28 = vadd.f32 %v1965_v17, %v417_v45  ;;  %v921_v32 = vmul.f32 %v3662_v30, %v3235_v9  ;;  %v953_v39 = vmul.f32 %v3664_v47, %v3235_v9  ;;  %v2002_v53 = vrot.slane %v927_v61, 9 }
 0x1e5   :  { %v325_v46 = vadd.f32 %v1954_v14, %v299_v37  ;;  %v1983_v35 = vrot.slane %v557_v7, 9  ;;  %v1988_v19 = vrot.slane %v583_v21, 10  ;;  %v1993_v56 = vrot.slane %v609_v12, 11  ;;  %v3667_v7 = vld [vmem:[#allocation17_spill] sm:$0xff]  ;;  %v3668_v12 = vld [vmem:[#allocation18_spill] sm:$0xff] }
 0x1e6   :  { %v469_v29 = vadd.f32 %v1970_v26, %v443_v28  ;;  %v979_v54 = vmul.f32 %v3665_v36, %v3235_v9  ;;  %v2007_v41 = vrot.slane %v953_v39, 10  ;;  %v1054_v52 = vmul.f32 %v3666_v2, %v3235_v9 }
 0x1e7   :  { %v351_v45 = vadd.f32 %v1959_v63, %v325_v46  ;;  %v577_v62 = vadd.f32 %v1983_v35, %v551_v57  ;;  %v947_v17 = vadd.f32 %v2002_v53, %v921_v32  ;;  %v1060_v21 = vmul.f32 %v3667_v7, %v3235_v9 }
 0x1e8   :  { %v495_v14 = vadd.f32 %v1975_v60, %v469_v29  ;;  %v2012_v37 = vrot.slane %v979_v54, 11  ;;  %v1086_v61 = vmul.f32 %v3668_v12, %v3235_v9  ;;  %v1112_v63 = vmul.f32 %v3669_v23, %v3235_v9  ;;  %v3670_v60 = vld [vmem:[#allocation20_spill] sm:$0xff] }
 0x1e9   :  { %v357_v26 = vadd.f32 %v2771_v5, %v351_v45  ;;  %v603_v28 = vadd.f32 %v1988_v19, %v577_v62  ;;  %v973_v46 = vadd.f32 %v2007_v41, %v947_v17  ;;  %v2019_v35 = vrot.slane %v1060_v21, 9  ;;  %v3671_v62 = vld [vmem:[#allocation22_spill] sm:$0xff]  ;;  %v3673_v17 = vld [vmem:[#allocation24_spill] sm:$0xff] }
 0x1ea   :  { %v501_v57 = vadd.f32 %v2792_v33, %v495_v14  ;;  %v1188_v32 = vmul.f32 %v3670_v60, %v3235_v9  ;;  %v2024_v53 = vrot.slane %v1086_v61, 10  ;;  %v2029_v54 = vrot.slane %v1112_v63, 11  ;;  %v3675_v63 = vld [vmem:[#allocation50_spill] sm:$0xff] }
 0x1eb   :  { %v371_v39 = vrot.slane %v357_v26, %v2744_v3  ;;  %v629_v29 = vadd.f32 %v1993_v56, %v603_v28  ;;  %v999_v19 = vadd.f32 %v2012_v37, %v973_v46  ;;  %v1080_v45 = vadd.f32 %v2019_v35, %v1054_v52  ;;  %v3672_v56 = vld [vmem:[#allocation23_spill] sm:$0xff]  ;;  %v3674_v37 = vld [vmem:[#allocation26_spill] sm:$0xff] }
 0x1ec   :  { %v515_v5 = vrot.slane %v501_v57, %v2744_v3  ;;  %v1194_v13 = vmul.f32 %v3671_v62, %v3235_v9  ;;  %v1220_v14 = vmul.f32 %v3672_v56, %v3235_v9  ;;  %v1246_v21 = vmul.f32 %v3673_v17, %v3235_v9 }
 0x1ed   :  { %v379_v33 = vcombine.low %v371_v39, %v378_v16  ;;  %v635_v41 = vadd.f32 %v2811_v40, %v629_v29  ;;  %v3298_v26 = vadd.f32 %v3674_v37, %v999_v19  ;;  %v1106_v28 = vadd.f32 %v2024_v53, %v1080_v45 }
 0x1ee   :  { %v523_v52 = vcombine.low %v515_v5, %v522_v42  ;;  %v2037_v61 = vrot.slane %v1194_v13, 9  ;;  %v2042_v16 = vrot.slane %v1220_v14, 10  ;;  %v2047_v57 = vrot.slane %v1246_v21, 11  ;;  %v3678_v42 = vld [vmem:[#allocation8_spill] sm:$0xff] }
 0x1ef   :  { %v401_v51 = vsel %vm400_vm11, %v3675_v63, %v379_v33  ;;  %v649_v40 = vrot.slane %v635_v41, %v2744_v3  ;;  %v1025_v13 = vrot.slane %v3298_v26, %v2744_v3  ;;  %v1132_v35 = vadd.f32 %v2029_v54, %v1106_v28  ;;  %v3679_v33 = vld [vmem:[#allocation27_spill] sm:$0xff]  ;;  %v3680_v54 = vld [vmem:[#allocation46_spill] sm:$0xff]  ;;  %v3681_v14 = vld [vmem:[#allocation48_spill] sm:$0xff] }
 0x1f0   :  { %v403_v24 = vsel %vm402_vm12, %v3675_v63, %v401_v51  ;;  %v542_v9 = vsel %vm400_vm11, %v3678_v42, %v523_v52  ;;  %v1214_v5 = vadd.f32 %v2037_v61, %v1188_v32  ;;  %v3682_v21 = vmax.f32 %v3680_v54, %v3681_v14 }
 0x1f1   :  { %v405_v39 = vsel %vm404_vm14, %v3675_v63, %v403_v24  ;;  %v543_v29 = vsel %vm402_vm12, %v3678_v42, %v542_v9  ;;  %v657_v53 = vcombine.low %v649_v40, %v656_v10  ;;  %v3326_v41 = vadd.f32 %v3679_v33, %v1132_v35  ;;  %v3683_v10 = vld [vmem:[#allocation9_spill] sm:$0xff] }
 0x1f2   :  { %v407_v19 = vsel %vm406_vm15, %v3675_v63, %v405_v39  ;;  %v544_v45 = vsel %vm404_vm14, %v3678_v42, %v543_v29  ;;  %v914_v52 = vmax.f32 %v3682_v21, %v3239_v31  ;;  %v1240_v28 = vadd.f32 %v2042_v16, %v1214_v5 }
 0x1f3   :  { %414 = vst.msk [vmem:[%s3514_s4] sm:$0x3f] %vm3304_vm2, %v407_v19  ;;  %v545_v18 = vsel %vm406_vm15, %v3678_v42, %v544_v45  ;;  %v676_v32 = vsel %vm400_vm11, %v3683_v10, %v657_v53  ;;  %v3684_v61 = vrot.slane %v3223_v20, 4  ;;  %v1158_v51 = vrot.slane %v3326_v41, %v2744_v3 }
 0x1f4   :  { %1980 = vst.msk [vmem:[%s3514_s4 + $0x6] sm:$0x3f] %vm3304_vm2, %v545_v18  ;;  %v677_v31 = vsel %vm402_vm12, %v3683_v10, %v676_v32  ;;  %v920_v40 = vmul.f32 %v3662_v30, %v914_v52  ;;  %v926_v16 = vmul.f32 %v3663_v0, %v914_v52  ;;  %v1266_v42 = vadd.f32 %v2047_v57, %v1240_v28  ;;  %v3685_v30 = vld [vmem:[#allocation28_spill] sm:$0xff] }
 0x1f5   :  { %v1521_v63 = vsel %vm257_vm8, %v3223_v20, %v3684_v61  ;;  %v678_v24 = vsel %vm404_vm14, %v3683_v10, %v677_v31  ;;  %v952_v9 = vmul.f32 %v3664_v47, %v914_v52  ;;  %v978_v35 = vmul.f32 %v3665_v36, %v914_v52 }
 0x1f6   :  { %v679_v39 = vsel %vm406_vm15, %v3683_v10, %v678_v24  ;;  %v2001_v29 = vrot.slane %v926_v16, 9  ;;  %v1053_v53 = vmul.f32 %v3666_v2, %v914_v52  ;;  %v1059_v5 = vmul.f32 %v3667_v7, %v914_v52  ;;  %v3687_v16 = vld [vmem:[#allocation49_spill] sm:$0xff] }
 0x1f7   :  { %1998 = vst.msk [vmem:[%s3514_s4 + $0xc] sm:$0x3f] %vm3304_vm2, %v679_v39  ;;  %v3370_v0 = vadd.f32 %v3685_v30, %v1266_v42  ;;  %v2006_v47 = vrot.slane %v952_v9, 10  ;;  %v2011_v57 = vrot.slane %v978_v35, 11  ;;  %v1085_v36 = vmul.f32 %v3668_v12, %v914_v52 }
 0x1f8   :  { %v946_v19 = vadd.f32 %v2001_v29, %v920_v40  ;;  %v2018_v45 = vrot.slane %v1059_v5, 9  ;;  %v1111_v54 = vmul.f32 %v3669_v23, %v914_v52  ;;  %v1187_v2 = vmul.f32 %v3670_v60, %v914_v52  ;;  %v3686_v40 = vld [vmem:[#allocation11_spill] sm:$0xff] }
 0x1f9   :  { %v1292_v7 = vrot.slane %v3370_v0, %v2744_v3  ;;  %v2023_v14 = vrot.slane %v1085_v36, 10  ;;  %v1193_v21 = vmul.f32 %v3671_v62, %v914_v52  ;;  %v1219_v18 = vmul.f32 %v3672_v56, %v914_v52 }
 0x1fa   :  { %v972_v10 = vadd.f32 %v2006_v47, %v946_v19  ;;  %v1079_v32 = vadd.f32 %v2018_v45, %v1053_v53  ;;  %v2028_v28 = vrot.slane %v1111_v54, 11  ;;  %v1245_v61 = vmul.f32 %v3673_v17, %v914_v52 }
 0x1fb   :  { %v2036_v12 = vrot.slane %v1193_v21, 9  ;;  %v2041_v31 = vrot.slane %v1219_v18, 10  ;;  %v3688_v23 = vmin.f32 %v3686_v40, %v3687_v16  ;;  %v3689_v60 = vrot.slane %v3223_v20, 4 }
 0x1fc   :  { %v3690_v42 = vrot.slane %v3225_v27, 4  ;;  %v998_v62 = vadd.f32 %v2011_v57, %v972_v10  ;;  %v1105_v35 = vadd.f32 %v2023_v14, %v1079_v32  ;;  %v2046_v56 = vrot.slane %v1245_v61, 11 }
 0x1fd   :  { %v1530_v24 = vmin.f32 %v3688_v23, %v1521_v63  ;;  %v1213_v29 = vadd.f32 %v2036_v12, %v1187_v2 }
 0x1fe   :  { %v1519_v9 = vsel %vm68_vm0, %v3690_v42, %v3689_v60  ;;  %v1004_v63 = vadd.f32 %v3674_v37, %v998_v62  ;;  %v1131_v20 = vadd.f32 %v2028_v28, %v1105_v35 }
 0x1ff   :  { %v1520_v39 = vsel %vm257_vm8, %v3225_v27, %v1519_v9  ;;  %v1536_v17 = vmul.f32 %v3643_v22, %v1530_v24  ;;  %v1542_v52 = vmul.f32 %v3640_v44, %v1530_v24  ;;  %v1568_v53 = vmul.f32 %v3641_v1, %v1530_v24 }
 0x200   :  { %v1594_v5 = vmul.f32 %v3642_v25, %v1530_v24  ;;  %v1669_v0 = vmul.f32 %v3645_v38, %v1530_v24  ;;  %v1239_v47 = vadd.f32 %v2041_v31, %v1213_v29  ;;  %v1675_v19 = vmul.f32 %v3644_v49, %v1530_v24 }
 0x201   :  { %v2055_v57 = vrot.slane %v1542_v52, 9  ;;  %v2060_v36 = vrot.slane %v1568_v53, 10  ;;  %v1018_v27 = vrot.slane %v1004_v63, %v2744_v3  ;;  %v1137_v45 = vadd.f32 %v3679_v33, %v1131_v20  ;;  %v3691_v52 = vld [vmem:[#allocation42_spill] sm:$0xff] }
 0x202   :  { %v2065_v54 = vrot.slane %v1594_v5, 11  ;;  %v1701_v2 = vmul.f32 %v3646_v11, %v1530_v24  ;;  %v1265_v14 = vadd.f32 %v2046_v56, %v1239_v47  ;;  %v2072_v37 = vrot.slane %v1675_v19, 9  ;;  %v3694_v19 = vld [vmem:[#allocation43_spill] sm:$0xff] }
 0x203   :  { %v1562_v21 = vadd.f32 %v2055_v57, %v1536_v17  ;;  %v1727_v18 = vmul.f32 %v3647_v4, %v1530_v24  ;;  %v1026_v10 = vcombine.low %v1018_v27, %v1025_v13  ;;  %v1151_v32 = vrot.slane %v1137_v45, %v2744_v3 }
 0x204   :  { %v2077_v28 = vrot.slane %v1701_v2, 10  ;;  %v1803_v61 = vmul.f32 %v3650_v59, %v1530_v24  ;;  %v1271_v12 = vadd.f32 %v3685_v30, %v1265_v14  ;;  %v1695_v31 = vadd.f32 %v2072_v37, %v1669_v0  ;;  %v3692_v0 = vld [vmem:[#allocation41_spill] sm:$0xff] }
 0x205   :  { %v1588_v33 = vadd.f32 %v2060_v36, %v1562_v21  ;;  %v2082_v40 = vrot.slane %v1727_v18, 11  ;;  %v1045_v16 = vsel %vm400_vm11, %v3147_v43, %v1026_v10  ;;  %v1159_v23 = vcombine.low %v1151_v32, %v1158_v51  ;;  %v3693_v36 = vld [vmem:[#allocation25_spill] sm:$0xff] }
 0x206   :  { %v1809_v26 = vmul.f32 %v3648_v8, %v1530_v24  ;;  %v1835_v13 = vmul.f32 %v3651_v58, %v1530_v24  ;;  %v1046_v60 = vsel %vm402_vm12, %v3147_v43, %v1045_v16  ;;  %v1285_v42 = vrot.slane %v1271_v12, %v2744_v3 }
 0x207   :  { %v1614_v30 = vadd.f32 %v2065_v54, %v1588_v33  ;;  %v1721_v9 = vadd.f32 %v2077_v28, %v1695_v31  ;;  %v1047_v62 = vsel %vm404_vm14, %v3147_v43, %v1046_v60  ;;  %v1178_v35 = vsel %vm400_vm11, %v3193_v50, %v1159_v23  ;;  %v3696_v54 = vld [vmem:[#allocation44_spill] sm:$0xff] }
 0x208   :  { %v2090_v56 = vrot.slane %v1809_v26, 9  ;;  %v2095_v41 = vrot.slane %v1835_v13, 10  ;;  %v1048_v51 = vsel %vm406_vm15, %v3147_v43, %v1047_v62  ;;  %v1179_v29 = vsel %vm402_vm12, %v3193_v50, %v1178_v35 }
 0x209   :  { %v1293_v17 = vcombine.low %v1285_v42, %v1292_v7  ;;  %v1620_v53 = vadd.f32 %v3691_v52, %v1614_v30  ;;  %1050 = vst.msk [vmem:[%s3515_s5] sm:$0x3f] %vm3304_vm2, %v1048_v51  ;;  %v1180_v63 = vsel %vm404_vm14, %v3193_v50, %v1179_v29  ;;  %v1747_v20 = vadd.f32 %v2082_v40, %v1721_v9 }
 0x20a   :  { %v1829_v5 = vadd.f32 %v2090_v56, %v1803_v61  ;;  %v1861_v47 = vmul.f32 %v3692_v0, %v1530_v24  ;;  %v1181_v43 = vsel %vm406_vm15, %v3193_v50, %v1180_v63  ;;  %v3695_v27 = vmin.f32 %v3693_v36, %v3694_v19 }
 0x20b   :  { %v1312_v7 = vsel %vm400_vm11, %v3208_v34, %v1293_v17  ;;  %v1640_v57 = vrot.slane %v1620_v53, %v2744_v3  ;;  %2033 = vst.msk [vmem:[%s3515_s5 + $0x6] sm:$0x3f] %vm3304_vm2, %v1181_v43  ;;  %v1753_v50 = vadd.f32 %v3696_v54, %v1747_v20  ;;  %v1659_v53 = vrot.slane %v3190_v6, 7 }
 0x20c   :  { %v1529_v45 = vmin.f32 %v3695_v27, %v1520_v39  ;;  %v1313_v24 = vsel %vm402_vm12, %v3208_v34, %v1312_v7  ;;  %v1855_v2 = vadd.f32 %v2095_v41, %v1829_v5  ;;  %v2100_v14 = vrot.slane %v1861_v47, 11 }
 0x20d   :  { %v1314_v21 = vsel %vm404_vm14, %v3208_v34, %v1313_v24  ;;  %v1773_v10 = vrot.slane %v1753_v50, %v2744_v3  ;;  %v1926_v36 = vrot.slane %v3213_v15, 7 }
 0x20e   :  { %v1541_v37 = vmul.f32 %v3640_v44, %v1529_v45  ;;  %v1567_v39 = vmul.f32 %v3641_v1, %v1529_v45  ;;  %v1315_v18 = vsel %vm406_vm15, %v3208_v34, %v1314_v21  ;;  %v1881_v32 = vadd.f32 %v2100_v14, %v1855_v2 }
 0x20f   :  { %v1593_v28 = vmul.f32 %v3642_v25, %v1529_v45  ;;  %2051 = vst.msk [vmem:[%s3515_s5 + $0xc] sm:$0x3f] %vm3304_vm2, %v1315_v18  ;;  %v1535_v61 = vmul.f32 %v3643_v22, %v1529_v45  ;;  %v1674_v1 = vmul.f32 %v3644_v49, %v1529_v45  ;;  %v1668_v34 = vmul.f32 %v3645_v38, %v1529_v45 }
 0x210   :  { %v2054_v12 = vrot.slane %v1541_v37, 9  ;;  %v2059_v44 = vrot.slane %v1567_v39, 10  ;;  %v1887_v33 = vadd.f32 %v3659_v48, %v1881_v32  ;;  %v1700_v31 = vmul.f32 %v3646_v11, %v1529_v45 }
 0x211   :  { %v1726_v25 = vmul.f32 %v3647_v4, %v1529_v45  ;;  %v2064_v16 = vrot.slane %v1593_v28, 11  ;;  %v2071_v23 = vrot.slane %v1674_v1, 9  ;;  %v1808_v26 = vmul.f32 %v3648_v8, %v1529_v45 }
 0x212   :  { %v1561_v40 = vadd.f32 %v2054_v12, %v1535_v61  ;;  %v1907_v13 = vrot.slane %v1887_v33, %v2744_v3  ;;  %v2076_v22 = vrot.slane %v1700_v31, 10  ;;  %v1802_v60 = vmul.f32 %v3650_v59, %v1529_v45 }
 0x213   :  { %v1834_v49 = vmul.f32 %v3651_v58, %v1529_v45  ;;  %v1694_v30 = vadd.f32 %v2071_v23, %v1668_v34  ;;  %v2089_v9 = vrot.slane %v1808_v26, 9  ;;  %v1860_v38 = vmul.f32 %v3692_v0, %v1529_v45 }
 0x214   :  { %v1587_v42 = vadd.f32 %v2059_v44, %v1561_v40  ;;  %v2081_v11 = vrot.slane %v1726_v25, 11  ;;  %v1792_v0 = vrot.slane %v3195_v55, 7 }
 0x215   :  { %v1720_v4 = vadd.f32 %v2076_v22, %v1694_v30  ;;  %v1828_v35 = vadd.f32 %v2089_v9, %v1802_v60  ;;  %v2094_v56 = vrot.slane %v1834_v49, 10  ;;  %v2099_v29 = vrot.slane %v1860_v38, 11 }
 0x216   :  { %v1613_v62 = vadd.f32 %v2064_v16, %v1587_v42 }
 0x217   :  { %v1746_v8 = vadd.f32 %v2081_v11, %v1720_v4  ;;  %v1854_v51 = vadd.f32 %v2094_v56, %v1828_v35 }
 0x218   :  { %v1619_v41 = vadd.f32 %v3691_v52, %v1613_v62 }
 0x219   :  { %v1752_v59 = vadd.f32 %v3696_v54, %v1746_v8  ;;  %v1880_v58 = vadd.f32 %v2099_v29, %v1854_v51 }
 0x21a   :  { %v1633_v17 = vrot.slane %v1619_v41, %v2744_v3 }
 0x21b   :  { %v1766_v20 = vrot.slane %v1752_v59, %v2744_v3  ;;  %v1886_v5 = vadd.f32 %v3659_v48, %v1880_v58 }
 0x21c   :  { %v1641_v63 = vcombine.low %v1633_v17, %v1640_v57 }
 0x21d   :  { %v1774_v52 = vcombine.low %v1766_v20, %v1773_v10  ;;  %v1900_v43 = vrot.slane %v1886_v5, %v2744_v3 }
 0x21e   :  { %v1660_v47 = vsel %vm400_vm11, %v1659_v53, %v1641_v63 }
 0x21f   :  { %v1661_v7 = vsel %vm402_vm12, %v1659_v53, %v1660_v47  ;;  %v1793_v6 = vsel %vm400_vm11, %v1792_v0, %v1774_v52  ;;  %v1908_v57 = vcombine.low %v1900_v43, %v1907_v13 }
 0x220   :  { %v1662_v19 = vsel %vm404_vm14, %v1659_v53, %v1661_v7  ;;  %v1794_v48 = vsel %vm402_vm12, %v1792_v0, %v1793_v6 }
 0x221   :  { %v1663_v27 = vsel %vm406_vm15, %v1659_v53, %v1662_v19  ;;  %v1795_v3 = vsel %vm404_vm14, %v1792_v0, %v1794_v48  ;;  %v1927_v55 = vsel %vm400_vm11, %v1926_v36, %v1908_v57 }
 0x222   :  { %1665 = vst.msk [vmem:[%s3516_s6] sm:$0x3f] %vm3304_vm2, %v1663_v27  ;;  %v1796_v15 = vsel %vm406_vm15, %v1792_v0, %v1795_v3  ;;  %v1928_v45 = vsel %vm402_vm12, %v1926_v36, %v1927_v55 }
 0x223   :  { %2086 = vst.msk [vmem:[%s3516_s6 + $0x6] sm:$0x3f] %vm3304_vm2, %v1796_v15  ;;  %v1929_v24 = vsel %vm404_vm14, %v1926_v36, %v1928_v45 }
 0x224   :  { %v1930_v54 = vsel %vm406_vm15, %v1926_v36, %v1929_v24 }
 0x225   :  { %2104 = vst.msk [vmem:[%s3516_s6 + $0xc] sm:$0x3f] %vm3304_vm2, %v1930_v54 }
 0x226   :  { %1946 = vsyncpa [#allocation3], 1 }
 0x227   :  { %1947 = vsyncpa [#allocation5], 1 }

</bundles_post_ra>
